<compile_context>
chip_gen: v7x
topology: tpu7x:2x2x1
jax: 0.10.0
libtpu: 0.0.40
codegen_flags: <defaults>
</compile_context>

<pallas_src>
import jax
import jax.numpy as jnp
from jax import lax
from jax.experimental import pallas as pl
from jax.experimental.pallas import tpu as pltpu


def _choose_pixel_tile(hw, c, k, *, want=1024, vmem_budget_bytes=20 << 20):
    """Pixel-tile size: always a multiple of 128 (lane-dense), VMEM-budgeted.

    Budget counts ~4 live f32 (K, tn) temporaries (scores, dist_rel, onehot,
    slack) plus ~6 (C, tn) rows (double-buffered in/out tiles + f32 copies).
    The wrapper pads the pixel axis up to a multiple of the returned tile.
    """
    per_lane_bytes = 4 * (4 * k + 6 * c)
    cap = min(want, vmem_budget_bytes // per_lane_bytes)
    cap = max(128, (cap // 128) * 128)
    if hw >= cap:
        return cap
    return max(128, -(-hw // 128) * 128)   # small maps: one lane-padded tile


def _split_grid(gj, max_inner=8):
    """Split pixel-tile count into (outer 'parallel', inner 'arbitrary')."""
    for gji in range(min(gj, max_inner), 0, -1):
        if gj % gji == 0:
            return gj // gji, gji
    return gj, 1


def vector_quantize_channel_major(x_cm, embed, *, want_tile=1024,
                                  use_bf16_scores=None):
    """x_cm: (B, C, HW) float, embed: (C, K) float codebook.

    Returns (quantized (B, C, HW), total sum-of-squared-error scalar).
    """
    B, C, HW = x_cm.shape
    Cd, K = embed.shape
    assert Cd == C, "codebook dim must match channel count"

    if use_bf16_scores is None:
        # bf16 scores only pay off once C is large enough to matter on the MXU;
        # keeping small-C in f32 also avoids near-tie selection flips in tests.
        use_bf16_scores = C >= 64

    tn = _choose_pixel_tile(HW, C, K, want=want_tile)
    hw_pad = -(-HW // tn) * tn
    n_pad = hw_pad - HW
    if n_pad:
        x_cm = jnp.pad(x_cm, ((0, 0), (0, 0), (0, n_pad)))

    gj = hw_pad // tn
    gjo, gji = _split_grid(gj)

    embed_f32 = embed.astype(jnp.float32)
    esq_half = 0.5 * jnp.sum(embed_f32 ** 2, axis=0)[:, None]      # (K, 1)

    def vq_kernel(x_ref, e_ref, esqh_ref, out_ref, loss_ref):
        ji = pl.program_id(2)

        @pl.when(ji == 0)
        def _init():
            loss_ref[...] = jnp.zeros_like(loss_ref)

        x = x_ref[0].astype(jnp.float32)            # (C, tn) channel-major tile
        e = e_ref[...].astype(jnp.float32)          # (C, K)  codebook
        esqh = esqh_ref[...]                        # (K, 1)  0.5 * ||e_k||^2

        # scores[k, n] = e_k . x_n  (contract over C on the MXU).
        if use_bf16_scores:
            scores = lax.dot_general(e.astype(jnp.bfloat16),
                                     x.astype(jnp.bfloat16),
                                     (((0,), (0,)), ((), ())),
                                     preferred_element_type=jnp.float32)
        else:
            scores = lax.dot_general(e, x, (((0,), (0,)), ((), ())),
                                     preferred_element_type=jnp.float32)

        # argmin_k ||x - e_k||^2 == argmin_k (0.5||e_k||^2 - e_k.x)
        dist_rel = esqh - scores                                   # (K, tn)
        min_rel = jnp.min(dist_rel, axis=0, keepdims=True)         # (1, tn)

        # Fused selection: a single equality mask against the min.  Exact
        # f32 ties (probability ~0 for continuous inputs) are averaged via an
        # exact 1/count scale (count == 1 -> multiply by exactly 1.0, bitwise
        # no-op) instead of "first occurrence" index tie-breaking.
        onehot = (dist_rel == min_rel).astype(jnp.float32)         # (K, tn)
        cnt = jnp.sum(onehot, axis=0, keepdims=True)               # (1, tn)

        # quantized vectors, channel-major: (C, K) @ (K, tn) -> (C, tn)  (MXU)
        quant = jnp.dot(e, onehot, preferred_element_type=jnp.float32)
        quant = quant * (1.0 / cnt)     # exact divide; ==1.0 unless exact tie

        # straight-through output == quant numerically; lane-dense store.
        out_ref[0] = quant.astype(out_ref.dtype)

        # commitment-loss partial from the identity
        #   ||x - e_sel||^2 = ||x||^2 + 2 * min_rel
        x2sum = jnp.sum(jnp.sum(x * x, axis=0, keepdims=True),
                        axis=1, keepdims=True)                     # (1, 1)
        mrsum = jnp.sum(min_rel, axis=1, keepdims=True)            # (1, 1)
        loss_ref[...] += (x2sum + 2.0 * mrsum)[None, None]         # (1,1,1,1)

    x_map = lambda b, jo, ji, g=gji: (b, 0, jo * g + ji)
    e_map = lambda b, jo, ji: (0, 0)
    loss_map = lambda b, jo, ji: (b, jo, 0, 0)

    # Single-buffer the constant codebook inputs only when they are big enough
    # that double-buffering them would actually hurt (v7x's 64 MiB VMEM).
    codebook_bytes = 4 * K * (C + 1)
    if codebook_bytes > (4 << 20):
        e_spec = pl.BlockSpec((C, K), e_map, pipeline_mode=pl.Buffered(1))
        s_spec = pl.BlockSpec((K, 1), e_map, pipeline_mode=pl.Buffered(1))
    else:
        e_spec = pl.BlockSpec((C, K), e_map)
        s_spec = pl.BlockSpec((K, 1), e_map)

    out_pad, partials = pl.pallas_call(
        vq_kernel,
        out_shape=(jax.ShapeDtypeStruct((B, C, hw_pad), x_cm.dtype),
                   jax.ShapeDtypeStruct((B, gjo, 1, 1), jnp.float32)),
        grid_spec=pltpu.PrefetchScalarGridSpec(
            num_scalar_prefetch=0,
            grid=(B, gjo, gji),
            in_specs=[
                pl.BlockSpec((1, C, tn), x_map),        # x tile
                e_spec,                                 # codebook (resident)
                s_spec,                                 # 0.5*||e||^2 (resident)
            ],
            out_specs=[
                pl.BlockSpec((1, C, tn), x_map),        # quantized tile
                pl.BlockSpec((1, 1, 1, 1), loss_map),   # per-(b, jo) loss partial
            ],
        ),
        compiler_params=pltpu.CompilerParams(
            dimension_semantics=("parallel", "parallel", "arbitrary"),
            vmem_limit_bytes=32 * 1024 * 1024),
    )(x_cm, embed_f32, esq_half)

    sse = jnp.sum(partials)
    if n_pad:
        # Padded zero-pixels contribute exactly min_k ||e_k||^2 each; remove it.
        sse = sse - (2.0 * jnp.min(esq_half)) * float(B * n_pad)
        out_pad = out_pad[:, :, :HW]
    return out_pad, sse


def permute_to_from_forward(x_nchw, embed, *, commitment=1.0):
    """PermuteToFrom(VectorQuantize).forward: NCHW in -> (NCHW out, scalar loss).

    The module's NCHW<->NHWC permutes are folded into the kernel's channel-major
    layout, so only free reshapes remain in the wrapper.
    """
    B, C, H, W = x_nchw.shape
    x_cm = x_nchw.reshape(B, C, H * W)
    out_cm, sse = vector_quantize_channel_major(x_cm, embed)
    out = out_cm.reshape(B, C, H, W)
    loss = sse * (commitment / float(B * C * H * W))
    return out, loss


def _reference(x_nchw, embed, commitment=1.0):
    """Plain-JAX reference mirroring lucidrains VectorQuantize forward."""
    B, C, H, W = x_nchw.shape
    flat = jnp.transpose(x_nchw, (0, 2, 3, 1)).reshape(-1, C)
    dist = (jnp.sum(flat ** 2, axis=1, keepdims=True)
            - 2.0 * flat @ embed
            + jnp.sum(embed ** 2, axis=0, keepdims=True))
    idx = jnp.argmin(dist, axis=-1)
    quant = embed.T[idx]
    loss = jnp.mean((quant - flat) ** 2) * commitment
    out = jnp.transpose(quant.reshape(B, H, W, C), (0, 3, 1, 2))
    return out, loss


if __name__ == "__main__":
    key = jax.random.PRNGKey(0)
    k_x, k_e = jax.random.split(key)

    B, C, H, W = 2, 4, 16, 16     # NCHW, channels = VQ dim
    K = 256                       # fq_dict_size default in unet_stylegan2

    x = jax.random.normal(k_x, (B, C, H, W), dtype=jnp.float32)
    embed = jax.random.normal(k_e, (C, K), dtype=jnp.float32)  # torch.randn(dim, n_embed)

    out, loss = permute_to_from_forward(x, embed)
    out = jax.block_until_ready(out)
    loss = jax.block_until_ready(loss)

    ref_out, ref_loss = _reference(x, embed)
    assert out.shape == (B, C, H, W)
    assert jnp.allclose(out, ref_out, atol=1e-5, rtol=1e-5)
    assert jnp.allclose(loss, ref_loss, atol=1e-5, rtol=1e-4)

    print("KERNEL_OK")
</pallas_src>

<mosaic_0001>
module attributes {stable_mosaic.version = 11 : i64} {
  func.func @vq_kernel(%arg0: i32, %arg1: i32, %arg2: i32, %arg3: memref<1x4x256xf32, #tpu.memory_space<vmem>>, %arg4: memref<4x256xf32, #tpu.memory_space<vmem>>, %arg5: memref<256x1xf32, #tpu.memory_space<vmem>>, %arg6: memref<1x4x256xf32, #tpu.memory_space<vmem>>, %arg7: memref<1x1x1x1xf32, #tpu.memory_space<vmem>>) attributes {dimension_semantics = [#tpu.dimension_semantics<parallel>, #tpu.dimension_semantics<parallel>, #tpu.dimension_semantics<arbitrary>], iteration_bounds = array<i64: 2, 1, 1>, scalar_prefetch = 0 : i64, scratch_operands = 0 : i64, tpu.core_type = #tpu.core_type<tc>, window_params = [{transform_indices = @transform_0, window_bounds = array<i64: 1, 4, 256>}, {pipeline_mode = #tpu.pipeline_mode<synchronous>, transform_indices = @transform_1, window_bounds = array<i64: 4, 256>}, {pipeline_mode = #tpu.pipeline_mode<synchronous>, transform_indices = @transform_2, window_bounds = array<i64: 256, 1>}, {transform_indices = @transform_3, window_bounds = array<i64: 1, 4, 256>}, {transform_indices = @transform_4, window_bounds = array<i64: 1, 1, 1, 1>}]} {
    %c0_i32 = arith.constant 0 : i32
    %0 = arith.cmpi eq, %arg2, %c0_i32 : i32
    %1 = arith.extui %0 : i1 to i32
    %c0_i32_0 = arith.constant 0 : i32
    %2 = arith.cmpi ne, %1, %c0_i32_0 : i32
    scf.if %2 {
      %cst_26 = arith.constant 0.000000e+00 : f32
      %40 = vector.broadcast %cst_26 : f32 to vector<1x1x1x1xf32>
      %c0_27 = arith.constant 0 : index
      %c0_28 = arith.constant 0 : index
      %c0_29 = arith.constant 0 : index
      %c0_30 = arith.constant 0 : index
      %41 = vector.load %arg7[%c0_27, %c0_28, %c0_29, %c0_30] : memref<1x1x1x1xf32, #tpu.memory_space<vmem>>, vector<1x1x1x1xf32>
      tpu.vector_store %arg7[%c0_27, %c0_28, %c0_29, %c0_30], %40 {strides = array<i32>} : memref<1x1x1x1xf32, #tpu.memory_space<vmem>>, vector<1x1x1x1xf32>,
    } else {
    }
    %c0 = arith.constant 0 : index
    %c0_1 = arith.constant 0 : index
    %c0_2 = arith.constant 0 : index
    %3 = vector.load %arg3[%c0, %c0_1, %c0_2] : memref<1x4x256xf32, #tpu.memory_space<vmem>>, vector<1x4x256xf32>
    %4 = vector.shape_cast %3 : vector<1x4x256xf32> to vector<4x256xf32>
    %c0_3 = arith.constant 0 : index
    %c0_4 = arith.constant 0 : index
    %5 = vector.load %arg4[%c0_3, %c0_4] : memref<4x256xf32, #tpu.memory_space<vmem>>, vector<4x256xf32>
    %c0_5 = arith.constant 0 : index
    %c0_6 = arith.constant 0 : index
    %6 = vector.load %arg5[%c0_5, %c0_6] : memref<256x1xf32, #tpu.memory_space<vmem>>, vector<256x1xf32>
    %cst = arith.constant dense<0.000000e+00> : vector<256x256xf32>
    %7 = tpu.matmul %5, %4, %cst {dimension_numbers = #tpu.dot_dimension_numbers<[0], [0], [1], [1], [0, 1, 1, 1], [], []>} : vector<4x256xf32>, vector<4x256xf32>, vector<256x256xf32> -> vector<256x256xf32>
    %8 = vector.broadcast %6 : vector<256x1xf32> to vector<256x256xf32>
    %9 = arith.subf %8, %7 : vector<256x256xf32>
    %cst_7 = arith.constant dense<0x7F800000> : vector<256xf32>
    %10 = vector.multi_reduction <minimumf>, %9, %cst_7 [0] : vector<256x256xf32> to vector<256xf32>
    %11 = vector.shape_cast %10 : vector<256xf32> to vector<1x256xf32>
    %12 = vector.broadcast %11 : vector<1x256xf32> to vector<256x256xf32>
    %13 = arith.cmpf oeq, %9, %12 : vector<256x256xf32>
    %14 = arith.extui %13 : vector<256x256xi1> to vector<256x256xi32>
    %15 = arith.sitofp %14 : vector<256x256xi32> to vector<256x256xf32>
    %cst_8 = arith.constant dense<0.000000e+00> : vector<256xf32>
    %16 = vector.multi_reduction <add>, %15, %cst_8 [0] : vector<256x256xf32> to vector<256xf32>
    %17 = vector.shape_cast %16 : vector<256xf32> to vector<1x256xf32>
    %cst_9 = arith.constant dense<0.000000e+00> : vector<4x256xf32>
    %18 = tpu.matmul %5, %15, %cst_9 {dimension_numbers = #tpu.dot_dimension_numbers<[1], [0], [0], [1], [0, 0, 1, 1], [], []>} : vector<4x256xf32>, vector<256x256xf32>, vector<4x256xf32> -> vector<4x256xf32>
    %cst_10 = arith.constant 1.000000e+00 : f32
    %19 = vector.broadcast %cst_10 : f32 to vector<1x256xf32>
    %20 = arith.divf %19, %17 : vector<1x256xf32>
    %21 = vector.broadcast %20 : vector<1x256xf32> to vector<4x256xf32>
    %22 = arith.mulf %18, %21 : vector<4x256xf32>
    %c0_11 = arith.constant 0 : index
    %c0_12 = arith.constant 0 : index
    %c0_13 = arith.constant 0 : index
    %23 = vector.load %arg6[%c0_11, %c0_12, %c0_13] : memref<1x4x256xf32, #tpu.memory_space<vmem>>, vector<1x4x256xf32>
    %24 = vector.shape_cast %23 : vector<1x4x256xf32> to vector<4x256xf32>
    %25 = vector.shape_cast %22 : vector<4x256xf32> to vector<1x4x256xf32>
    tpu.vector_store %arg6[%c0_11, %c0_12, %c0_13], %25 {strides = array<i32>} : memref<1x4x256xf32, #tpu.memory_space<vmem>>, vector<1x4x256xf32>,
    %26 = arith.mulf %4, %4 : vector<4x256xf32>
    %cst_14 = arith.constant dense<0.000000e+00> : vector<256xf32>
    %27 = vector.multi_reduction <add>, %26, %cst_14 [0] : vector<4x256xf32> to vector<256xf32>
    %28 = vector.shape_cast %27 : vector<256xf32> to vector<1x256xf32>
    %cst_15 = arith.constant dense<0.000000e+00> : vector<1xf32>
    %29 = vector.multi_reduction <add>, %28, %cst_15 [1] : vector<1x256xf32> to vector<1xf32>
    %30 = vector.shape_cast %29 : vector<1xf32> to vector<1x1xf32>
    %cst_16 = arith.constant dense<0.000000e+00> : vector<1xf32>
    %31 = vector.multi_reduction <add>, %11, %cst_16 [1] : vector<1x256xf32> to vector<1xf32>
    %32 = vector.shape_cast %31 : vector<1xf32> to vector<1x1xf32>
    %c0_17 = arith.constant 0 : index
    %c0_18 = arith.constant 0 : index
    %c0_19 = arith.constant 0 : index
    %c0_20 = arith.constant 0 : index
    %33 = vector.load %arg7[%c0_17, %c0_18, %c0_19, %c0_20] : memref<1x1x1x1xf32, #tpu.memory_space<vmem>>, vector<1x1x1x1xf32>
    %cst_21 = arith.constant 2.000000e+00 : f32
    %34 = vector.broadcast %cst_21 : f32 to vector<1x1xf32>
    %35 = arith.mulf %34, %32 : vector<1x1xf32>
    %36 = arith.addf %30, %35 : vector<1x1xf32>
    %37 = vector.shape_cast %36 : vector<1x1xf32> to vector<1x1x1x1xf32>
    %38 = arith.addf %33, %37 : vector<1x1x1x1xf32>
    %c0_22 = arith.constant 0 : index
    %c0_23 = arith.constant 0 : index
    %c0_24 = arith.constant 0 : index
    %c0_25 = arith.constant 0 : index
    %39 = vector.load %arg7[%c0_22, %c0_23, %c0_24, %c0_25] : memref<1x1x1x1xf32, #tpu.memory_space<vmem>>, vector<1x1x1x1xf32>
    tpu.vector_store %arg7[%c0_22, %c0_23, %c0_24, %c0_25], %38 {strides = array<i32>} : memref<1x1x1x1xf32, #tpu.memory_space<vmem>>, vector<1x1x1x1xf32>,
    return
  }
  func.func @transform_0(%arg0: i32, %arg1: i32, %arg2: i32) -> (i32, i32, i32) {
    %c1_i32 = arith.constant 1 : i32
    %0 = arith.muli %arg1, %c1_i32 : i32
    %1 = arith.addi %0, %arg2 : i32
    %c0_i32 = arith.constant 0 : i32
    %c0_i32_0 = arith.constant 0 : i32
    return %arg0, %c0_i32, %1 : i32, i32, i32
  }
  func.func @transform_1(%arg0: i32, %arg1: i32, %arg2: i32) -> (i32, i32) {
    %c0_i32 = arith.constant 0 : i32
    %c0_i32_0 = arith.constant 0 : i32
    %c0_i32_1 = arith.constant 0 : i32
    return %c0_i32, %c0_i32_0 : i32, i32
  }
  func.func @transform_2(%arg0: i32, %arg1: i32, %arg2: i32) -> (i32, i32) {
    %c0_i32 = arith.constant 0 : i32
    %c0_i32_0 = arith.constant 0 : i32
    %c0_i32_1 = arith.constant 0 : i32
    return %c0_i32, %c0_i32_0 : i32, i32
  }
  func.func @transform_3(%arg0: i32, %arg1: i32, %arg2: i32) -> (i32, i32, i32) {
    %c1_i32 = arith.constant 1 : i32
    %0 = arith.muli %arg1, %c1_i32 : i32
    %1 = arith.addi %0, %arg2 : i32
    %c0_i32 = arith.constant 0 : i32
    %c0_i32_0 = arith.constant 0 : i32
    return %arg0, %c0_i32, %1 : i32, i32, i32
  }
  func.func @transform_4(%arg0: i32, %arg1: i32, %arg2: i32) -> (i32, i32, i32, i32) {
    %c0_i32 = arith.constant 0 : i32
    %c0_i32_0 = arith.constant 0 : i32
    %c0_i32_1 = arith.constant 0 : i32
    return %arg0, %arg1, %c0_i32, %c0_i32_0 : i32, i32, i32, i32
  }
}

</mosaic_0001>

<bundles_post_ra>
// kernel: tpu_custom_call.1
= control target key start
LH: loop header
LB: loop body
LE: loop exit
PB: predicated region body
PF: predicated region fallthrough
CT: control target
= control target key end

     0   :  { %10 = vsyncpa [#allocation3], 0  ;;  %s3198_s0 = inlined_call_operand.vmem [shape: f32[2,4,256], index: 0, kind: input, shape index: {}]   ;;  %s3199_s1 = inlined_call_operand.vmem [shape: f32[4,256], index: 1, kind: input, shape index: {}]   ;;  %s3200_s2 = inlined_call_operand.vmem [shape: f32[256,1], index: 2, kind: input, shape index: {}]   ;;  %s3201_s3 = inlined_call_operand.hbm [shape: f32[2,4,256], index: 3, kind: output, shape index: {0}]   ;;  %s3202_s4 = inlined_call_operand.vmem [shape: f32[2,1,1,1], index: 4, kind: output, shape index: {1}]  }
   0x1   :  { %12 = vsyncpa [#allocation3 + $0x1], 0  ;;  %s1955_s15 = smov 0   ;;  %s1957_s16 = smov 0  }
   0x2   :  { %s1959_s17 = smov 0   ;;  %s1961_s18 = smov 0  }
   0x3   :  { %s1963_s19 = smov 0   ;;  %s1965_s20 = smov 0  }
   0x4 LB: > { %s1538_s21 = sadd.s32 4294967295, %s1924_s20   ;;  %s1539_s22 = sadd.s32 4294967294, %s1924_s20   ;;  %s1924_s20 = sphi %s1965_s20, %s18_s20   ;;  %s1920_s19 = sphi %s1963_s19, %s3438_s19   ;;  %s1916_s18 = sphi %s1961_s18, %s3437_s18   ;;  %s1912_s17 = sphi %s1959_s17, %s3436_s17   ;;  %s1908_s16 = sphi %s1957_s16, %s3435_s16   ;;  %s1904_s15 = sphi %s1955_s15, %s3434_s15  }
   0x5   : > { %s37_s23 = sadd.s32 1, %s1920_s19  ;;  %s120_s24 = sadd.s32 1, %s1912_s17 }
   0x6   : > { %p39_p0 = scmp.ge.s32.totalorder %s37_s23, 2  ;;  %p130_p1 = scmp.ne.s32.totalorder %s1912_s17, %s1908_s16 }
   0x7   : > { %p131_p2 = scmp.eq.s32.totalorder %s1538_s21, 1  ;;  %p136_p3 = scmp.ne.s32.totalorder %s1908_s16, %s1904_s15 }
   0x8   : > { %s3440_s23 = smov (%p39_p0, %s37_s23), 0  ;;  %p137_p5 = scmp.eq.s32.totalorder %s1539_s22, 1 }
   0x9   : > { %p1995_p4 = por %p131_p2, %p130_p1  ;;  %s115_s26 = ssub.s32 %s1920_s19, %s3440_s23 }
   0xa   : > { %p1542_p6 = scmp.ge.s32.totalorder %s1924_s20, 1  ;;  %p118_p7 = scmp.eq.s32.totalorder %s115_s26, 0 }
   0xb   : > { %p2002_p8 = por %p137_p5, %p136_p3  ;;  %p204_p9 = scmp.lt.s32.totalorder %s1924_s20, 3 }
   0xc   : > { %s2008_s28 = scalar_select %p118_p7, %s1912_s17, %s120_s24  }
   0xd   : > { %p205_p10 = pnand %p1542_p6, %p204_p9 }
   0xf   : > { %208 = sbr.rel (%p205_p10) target bundleno = 828 (0x33c), region = 32 }
  0x16   : > { %v268_v0 = vld [vmem:[%s3199_s1] sm:$0xff]  ;;  %p243_p11 = scmp.lt.s32.totalorder %s1916_s18, 1  ;;  %v1926_v3 = vmov 0   ;;  %v3203_v4 = vmov 0.0   ;;  %v270_v5 = vld [vmem:[%s3200_s2 + $0x8] sm:$0xff]  ;;  %vm467_vm0 = vcmask 1043456  }
  0x17   : > { %v269_v1 = vld [vmem:[%s3200_s2] sm:$0xff]  ;;  %304 = vxpose.xlu0.b32.start.end [1/1] (short) %v268_v0, 128  ;;  %v302_v2 = vcombine.high %v268_v0, %v268_v0  ;;  %1837 = vset.pattern.permute.xlu1 %v1926_v3  ;;  %v271_v7 = vld [vmem:[%s3200_s2 + $0x10] sm:$0xff]  ;;  %v272_v12 = vld [vmem:[%s3200_s2 + $0x18] sm:$0xff]  ;;  %vm370_vm1 = vcmask 31744   ;;  %s230_s26 = sand.u32 1, %s1908_s16   ;;  %s1714_s30 = sshll.u32 %s1916_s18, 7 }
  0x18   : > { %731 = vperm.xlu1 %1837, %v269_v1   ;;  %s2019_s7 = scalar_select %p243_p11, %s1916_s18, 1  ;;  %536 = vmatprep.mubr.f32.mxu0 %v3203_v4  ;;  %v273_v14 = vld [vmem:[%s3200_s2 + $0x20] sm:$0xff]  ;;  %v274_v15 = vld [vmem:[%s3200_s2 + $0x28] sm:$0xff]  ;;  %v275_v16 = vld [vmem:[%s3200_s2 + $0x30] sm:$0xff] }
  0x19   : > { %1357 = vmatprep.mubr.f32.mxu1 %v302_v2  ;;  %v276_v17 = vld [vmem:[%s3200_s2 + $0x38] sm:$0xff]  ;;  %v277_v18 = vld [vmem:[%s3200_s2 + $0x40] sm:$0xff]  ;;  %v278_v19 = vld [vmem:[%s3200_s2 + $0x48] sm:$0xff]  ;;  %s1543_s29 = sshll.u32 %s230_s26, 3  ;;  %s1406_s11 = scalar_lea.sflag [#allocation3], %s230_s26 }
  0x1a   : > { %s1713_s10 = sshll.u32 %s2019_s7, 3  ;;  %v279_v20 = vld [vmem:[%s3200_s2 + $0x50] sm:$0xff]  ;;  %v280_v21 = vld [vmem:[%s3200_s2 + $0x58] sm:$0xff]  ;;  %v281_v22 = vld [vmem:[%s3200_s2 + $0x60] sm:$0xff]  ;;  %s2846_s22 = scalar_lea.vmem %s3202_s4, %s2019_s7 }
  0x1b   : > { %s250_s13 = scalar_lea.vmem %s3198_s0, %s1713_s10  ;;  %v282_v23 = vld [vmem:[%s3200_s2 + $0x68] sm:$0xff]  ;;  %v283_v24 = vld [vmem:[%s3200_s2 + $0x70] sm:$0xff]  ;;  %v284_v25 = vld [vmem:[%s3200_s2 + $0x78] sm:$0xff]  ;;  %s232_s5 = scalar_lea.vmem [#allocation2], %s1543_s29 }
  0x1c   : > { %736 = vperm.xlu1 %1837, %v270_v5   ;;  %v267_v6 = vld [vmem:[%s250_s13] sm:$0xff]  ;;  %v287_v27 = vld [vmem:[%s3200_s2 + $0x90] sm:$0xff]  ;;  %v288_v28 = vld [vmem:[%s3200_s2 + $0x98] sm:$0xff]  ;;  %s1429_s6 = sshll.u32 %s232_s5, 4  ;;  %s3151_s10 = scalar_lea.hbm %s3201_s3, %s1714_s30  ;;  %s3153_s6 = int_to_ptr.vmem [resolvable:$true] %s1429_s6 }
  0x1d   : > { %v369_v8 = vcombine.high %v267_v6, %v267_v6  ;;  %v1375_v9 = vmul.f32 %v267_v6, %v267_v6  ;;  %v285_v26 = vld [vmem:[%s3200_s2 + $0x80] sm:$0xff]  ;;  %v290_v30 = vld [vmem:[%s3200_s2 + $0xa8] sm:$0xff]  ;;  %v291_v31 = vld [vmem:[%s3200_s2 + $0xb0] sm:$0xff]  ;;  %s1846_s12 = scalar_lea.vmem %s3153_s6, 128  ;;  %s1929_s18 = smov [#allocation2]  }
  0x1e   : > { %v289_v29 = vld [vmem:[%s3200_s2 + $0xa0] sm:$0xff]  ;;  %v292_v32 = vld [vmem:[%s3200_s2 + $0xb8] sm:$0xff]  ;;  %v294_v34 = vld [vmem:[%s3200_s2 + $0xc8] sm:$0xff]  ;;  %p1847_p12 = scmp.ne.s32.totalorder %s3153_s6, %s1846_s12  ;;  %s1850_s13 = sshll.u32 %s1929_s18, 4  ;;  %s1851_s13 = int_to_ptr.vmem [resolvable:$false] %s1850_s13 }
  0x1f   : > { %1546 = vmatprep.subr.msk.mxu0 %vm467_vm0, %v369_v8  ;;  %v1377_v10 = vcombine.high %v1375_v9, %v1375_v9  ;;  %v2032_v11 = vsel %vm467_vm0, %v1375_v9, 0.0  ;;  %v293_v33 = vld [vmem:[%s3200_s2 + $0xc0] sm:$0xff]  ;;  %v295_v35 = vld [vmem:[%s3200_s2 + $0xd0] sm:$0xff]  ;;  %v296_v36 = vld [vmem:[%s3200_s2 + $0xd8] sm:$0xff]  ;;  %s1852_s14 = scalar_lea.vmem %s1851_s13, 256  ;;  %p1853_p1 = scmp.lt.s32.totalorder %s3153_s6, %s1851_s13 }
  0x20   : > { %741 = vperm.xlu1 %1837, %v271_v7   ;;  %1547 = vmatpush1.msk.msra.mxu0 %vm467_vm0, %v267_v6  ;;  %v297_v37 = vld [vmem:[%s3200_s2 + $0xe0] sm:$0xff]  ;;  %v298_v38 = vld [vmem:[%s3200_s2 + $0xe8] sm:$0xff]  ;;  %v299_v39 = vld [vmem:[%s3200_s2 + $0xf0] sm:$0xff]  ;;  %p1848_p13 = pnand %p1847_p12, %p1995_p4  ;;  %p1854_p2 = scmp.lt.s32.totalorder %s1852_s14, %s1846_s12 }
  0x21   : > { %v2037_v13 = vsel %vm467_vm0, %v1377_v10, 0.0  ;;  %v300_v40 = vld [vmem:[%s3200_s2 + $0xf8] sm:$0xff]  ;;  %v286_v49 = vld [vmem:[%s3200_s2 + $0x88] sm:$0xff] }
  0x22   : > { %p1849_p0 = pneg %p1848_p13  ;;  %p1855_p3 = por %p1854_p2, %p1853_p1 }
  0x24   : > { %746 = vperm.xlu1 %1837, %v272_v12   ;;  %p1856_p5 = pnand %p1855_p3, %p1849_p0 }
  0x28   : > { %751 = vperm.xlu1 %1837, %v273_v14  }
  0x2c   : > { %756 = vperm.xlu1 %1837, %v274_v15  }
  0x30   : > { %761 = vperm.xlu1 %1837, %v275_v16  }
  0x34   : > { %766 = vperm.xlu1 %1837, %v276_v17  }
  0x38   : > { %771 = vperm.xlu1 %1837, %v277_v18  }
  0x3c   : > { %776 = vperm.xlu1 %1837, %v278_v19  }
  0x40   : > { %781 = vperm.xlu1 %1837, %v279_v20  }
  0x44   : > { %786 = vperm.xlu1 %1837, %v280_v21  }
  0x48   : > { %791 = vperm.xlu1 %1837, %v281_v22  }
  0x4c   : > { %796 = vperm.xlu1 %1837, %v282_v23  }
  0x50   : > { %801 = vperm.xlu1 %1837, %v283_v24  }
  0x54   : > { %336 = vxpose.xlu0.b32.start.end [1/1] (short) %v302_v2, 128  ;;  %806 = vperm.xlu1 %1837, %v284_v25  }
  0x58   : > { %811 = vperm.xlu1 %1837, %v285_v26  }
  0x5c   : > { %821 = vperm.xlu1 %1837, %v287_v27  }
  0x60   : > { %826 = vperm.xlu1 %1837, %v288_v28  }
  0x64   : > { %831 = vperm.xlu1 %1837, %v289_v29  }
  0x68   : > { %836 = vperm.xlu1 %1837, %v290_v30  }
  0x6c   : > { %841 = vperm.xlu1 %1837, %v291_v31  }
  0x70   : > { %846 = vperm.xlu1 %1837, %v292_v32  }
  0x74   : > { %851 = vperm.xlu1 %1837, %v293_v33  }
  0x78   : > { %856 = vperm.xlu1 %1837, %v294_v34  }
  0x7c   : > { %861 = vperm.xlu1 %1837, %v295_v35  }
  0x7d   : > { %1838 = vset.pattern.permute.xlu0 %v1926_v3 }
  0x80   : > { %866 = vperm.xlu1 %1837, %v296_v36  }
  0x84   : > { %871 = vperm.xlu1 %1837, %v297_v37  }
  0x88   : > { %876 = vperm.xlu1 %1837, %v298_v38  }
  0x8c   : > { %881 = vperm.xlu1 %1837, %v299_v39  }
  0x90   : > { %886 = vperm.xlu1 %1837, %v300_v40  }
  0x97   : > { %v320_v41 = vpop.trf.xlu0  ;;  %v732_v12 = vpop.permute.xlu1 %731 }
  0x98   : > { %1548 = vmatmul.mubr.msk.f32.vlgmr.msra.gmra.mrb[0].mxu0 %vm370_vm1, %v320_v41 }
  0x99   : > { %542 = vmatprep.mubr.f32.mxu0 %v3203_v4 }
  0x9b   : > { %v321_v42 = vpop.trf.xlu0  ;;  %v737_v14 = vpop.permute.xlu1 %736 }
  0x9c   : > { %1549 = vmatmul.mubr.msk.f32.gmra.mrb[2].mxu0 %vm370_vm1, %v321_v42 }
  0x9d   : > { %548 = vmatprep.mubr.f32.mxu0 %v3203_v4 }
  0x9f   : > { %v322_v43 = vpop.trf.xlu0  ;;  %v742_v15 = vpop.permute.xlu1 %741 }
  0xa0   : > { %1550 = vmatmul.mubr.msk.f32.gmra.mrb[4].mxu0 %vm370_vm1, %v322_v43 }
  0xa1   : > { %554 = vmatprep.mubr.f32.mxu0 %v3203_v4 }
  0xa3   : > { %v323_v44 = vpop.trf.xlu0  ;;  %v747_v16 = vpop.permute.xlu1 %746 }
  0xa4   : > { %1551 = vmatmul.mubr.msk.f32.gmra.mrb[6].mxu0 %vm370_vm1, %v323_v44 }
  0xa5   : > { %560 = vmatprep.mubr.f32.mxu0 %v3203_v4 }
  0xa7   : > { %v324_v45 = vpop.trf.xlu0  ;;  %v752_v17 = vpop.permute.xlu1 %751 }
  0xa8   : > { %1552 = vmatmul.mubr.msk.f32.gmra.mrb[8].mxu0 %vm370_vm1, %v324_v45 }
  0xa9   : > { %566 = vmatprep.mubr.f32.mxu0 %v3203_v4 }
  0xab   : > { %v325_v46 = vpop.trf.xlu0  ;;  %v757_v18 = vpop.permute.xlu1 %756 }
  0xac   : > { %1553 = vmatmul.mubr.msk.f32.gmra.mrb[10].mxu0 %vm370_vm1, %v325_v46 }
  0xad   : > { %572 = vmatprep.mubr.f32.mxu0 %v3203_v4 }
  0xaf   : > { %v326_v47 = vpop.trf.xlu0  ;;  %v762_v19 = vpop.permute.xlu1 %761 }
  0xb0   : > { %1554 = vmatmul.mubr.msk.f32.gmra.mrb[12].mxu0 %vm370_vm1, %v326_v47 }
  0xb1   : > { %578 = vmatprep.mubr.f32.mxu0 %v3203_v4 }
  0xb3   : > { %v327_v48 = vpop.trf.xlu0  ;;  %v767_v20 = vpop.permute.xlu1 %766 }
  0xb4   : > { %1555 = vmatmul.mubr.msk.f32.gmra.mrb[14].mxu0 %vm370_vm1, %v327_v48 }
  0xb5   : > { %584 = vmatprep.mubr.f32.mxu0 %v3203_v4 }
  0xb7   : > { %v328_v50 = vpop.trf.xlu0  ;;  %v772_v21 = vpop.permute.xlu1 %771 }
  0xb8   : > { %1556 = vmatmul.mubr.msk.f32.gmra.mrb[16].mxu0 %vm370_vm1, %v328_v50 }
  0xb9   : > { %590 = vmatprep.mubr.f32.mxu0 %v3203_v4  ;;  %816 = vperm.xlu0 %1838, %v286_v49  }
  0xbb   : > { %v329_v51 = vpop.trf.xlu0  ;;  %v777_v22 = vpop.permute.xlu1 %776 }
  0xbc   : > { %1557 = vmatmul.mubr.msk.f32.gmra.mrb[18].mxu0 %vm370_vm1, %v329_v51 }
  0xbd   : > { %596 = vmatprep.mubr.f32.mxu0 %v3203_v4 }
  0xbf   : > { %v330_v52 = vpop.trf.xlu0  ;;  %v2187_v25 = vpop.permute.xlu1 %781 }
  0xc0   : > { %1558 = vmatmul.mubr.msk.f32.gmra.mrb[20].mxu0 %vm370_vm1, %v330_v52 }
  0xc1   : > { %602 = vmatprep.mubr.f32.mxu0 %v3203_v4 }
  0xc3   : > { %v331_v53 = vpop.trf.xlu0  ;;  %v2189_v29 = vpop.permute.xlu1 %786 }
  0xc4   : > { %1559 = vmatmul.mubr.msk.f32.gmra.mrb[22].mxu0 %vm370_vm1, %v331_v53 }
  0xc5   : > { %608 = vmatprep.mubr.f32.mxu0 %v3203_v4 }
  0xc7   : > { %v332_v54 = vpop.trf.xlu0  ;;  %v2211_v43 = vpop.permute.xlu1 %791 }
  0xc8   : > { %1560 = vmatmul.mubr.msk.f32.gmra.mrb[24].mxu0 %vm370_vm1, %v332_v54 }
  0xc9   : > { %614 = vmatprep.mubr.f32.mxu0 %v3203_v4 }
  0xcb   : > { %v333_v55 = vpop.trf.xlu0  ;;  %v2223_v53 = vpop.permute.xlu1 %796 }
  0xcc   : > { %1561 = vmatmul.mubr.msk.f32.gmra.mrb[26].mxu0 %vm370_vm1, %v333_v55 }
  0xcd   : > { %620 = vmatprep.mubr.f32.mxu0 %v3203_v4 }
  0xcf   : > { %v334_v56 = vpop.trf.xlu0 }
  0xd0   : > { %1562 = vmatmul.mubr.msk.f32.gmra.mrb[28].mxu0 %vm370_vm1, %v334_v56 }
  0xd1   : > { %626 = vmatprep.mubr.f32.mxu0 %v3203_v4 }
  0xd3   : > { %v335_v57 = vpop.trf.xlu0 }
  0xd4   : > { %1563 = vmatmul.mubr.msk.f32.gmra.mrb[30].mxu0 %vm370_vm1, %v335_v57 }
  0xd5   : > { %632 = vmatprep.mubr.f32.mxu0 %v3203_v4 }
  0xd7   : > { %v352_v58 = vpop.trf.xlu0 }
  0xd8   : > { %1564 = vmatmul.mubr.msk.f32.gmra.mrb[32].mxu0 %vm370_vm1, %v352_v58 }
  0xd9   : > { %638 = vmatprep.mubr.f32.mxu0 %v3203_v4 }
  0xdb   : > { %v353_v59 = vpop.trf.xlu0 }
  0xdc   : > { %1565 = vmatmul.mubr.msk.f32.gmra.mrb[34].mxu0 %vm370_vm1, %v353_v59 }
  0xdd   : > { %644 = vmatprep.mubr.f32.mxu0 %v3203_v4 }
  0xdf   : > { %v354_v60 = vpop.trf.xlu0 }
  0xe0   : > { %1566 = vmatmul.mubr.msk.f32.gmra.mrb[36].mxu0 %vm370_vm1, %v354_v60 }
  0xe1   : > { %650 = vmatprep.mubr.f32.mxu0 %v3203_v4 }
  0xe3   : > { %v355_v61 = vpop.trf.xlu0 }
  0xe4   : > { %1567 = vmatmul.mubr.msk.f32.gmra.mrb[38].mxu0 %vm370_vm1, %v355_v61 }
  0xe5   : > { %656 = vmatprep.mubr.f32.mxu0 %v3203_v4 }
  0xe7   : > { %v356_v62 = vpop.trf.xlu0 }
  0xe8   : > { %1568 = vmatmul.mubr.msk.f32.gmra.mrb[40].mxu0 %vm370_vm1, %v356_v62 }
  0xe9   : > { %662 = vmatprep.mubr.f32.mxu0 %v3203_v4 }
  0xeb   : > { %v357_v63 = vpop.trf.xlu0 }
  0xec   : > { %1569 = vmatmul.mubr.msk.f32.gmra.mrb[42].mxu0 %vm370_vm1, %v357_v63  ;;  %v2235_v63 = vpop.permute.xlu1 %801 }
  0xed   : > { %668 = vmatprep.mubr.f32.mxu0 %v3203_v4 }
  0xef   : > { %v358_v0 = vpop.trf.xlu0 }
  0xf0   : > { %1570 = vmatmul.mubr.msk.f32.gmra.mrb[44].mxu0 %vm370_vm1, %v358_v0 }
  0xf1   : > { %674 = vmatprep.mubr.f32.mxu0 %v3203_v4 }
  0xf3   : > { %v359_v1 = vpop.trf.xlu0 }
  0xf4   : > { %1571 = vmatmul.mubr.msk.f32.gmra.mrb[46].mxu0 %vm370_vm1, %v359_v1 }
  0xf5   : > { %680 = vmatprep.mubr.f32.mxu0 %v3203_v4 }
  0xf7   : > { %v360_v2 = vpop.trf.xlu0 }
  0xf8   : > { %1572 = vmatmul.mubr.msk.f32.gmra.mrb[48].mxu0 %vm370_vm1, %v360_v2 }
  0xf9   : > { %686 = vmatprep.mubr.f32.mxu0 %v3203_v4 }
  0xfb   : > { %v361_v3 = vpop.trf.xlu0 }
  0xfc   : > { %1573 = vmatmul.mubr.msk.f32.gmra.mrb[50].mxu0 %vm370_vm1, %v361_v3 }
  0xfd   : > { %692 = vmatprep.mubr.f32.mxu0 %v3203_v4 }
  0xff   : > { %v362_v5 = vpop.trf.xlu0 }
 0x100   : > { %1574 = vmatmul.mubr.msk.f32.gmra.mrb[52].mxu0 %vm370_vm1, %v362_v5 }
 0x101   : > { %698 = vmatprep.mubr.f32.mxu0 %v3203_v4 }
 0x103   : > { %v363_v6 = vpop.trf.xlu0 }
 0x104   : > { %1575 = vmatmul.mubr.msk.f32.gmra.mrb[54].mxu0 %vm370_vm1, %v363_v6 }
 0x105   : > { %704 = vmatprep.mubr.f32.mxu0 %v3203_v4 }
 0x107   : > { %v364_v7 = vpop.trf.xlu0 }
 0x108   : > { %1576 = vmatmul.mubr.msk.f32.gmra.mrb[56].mxu0 %vm370_vm1, %v364_v7 }
 0x109   : > { %710 = vmatprep.mubr.f32.mxu0 %v3203_v4 }
 0x10b   : > { %v365_v8 = vpop.trf.xlu0 }
 0x10c   : > { %1577 = vmatmul.mubr.msk.f32.gmra.mrb[58].mxu0 %vm370_vm1, %v365_v8 }
 0x10d   : > { %716 = vmatprep.mubr.f32.mxu0 %v3203_v4 }
 0x10f   : > { %v366_v9 = vpop.trf.xlu0 }
 0x110   : > { %1578 = vmatmul.mubr.msk.f32.gmra.mrb[60].mxu0 %vm370_vm1, %v366_v9 }
 0x111   : > { %722 = vmatprep.mubr.f32.mxu0 %v3203_v4 }
 0x113   : > { %v367_v10 = vpop.trf.xlu0 }
 0x114   : > { %1579 = vmatmul.mubr.msk.f32.gmra.mrb[62].mxu0 %vm370_vm1, %v367_v10  ;;  %v2245_v10 = vpop.permute.xlu1 %806 }
 0x16b   : > { %v538_v23 = vpop.f32.mrb[0].mxu0 }
 0x16c   : > { %v540_v24 = vpop.f32.mrb[1].mxu0  ;;  %v2191_v30 = vsub.f32 %v732_v12, %v538_v23  ;;  %v1380_v23 = vrot.slane %v2032_v11, 4 }
 0x16d   : > { %v2195_v33 = vsub.f32 %v732_v12, %v540_v24  ;;  %v1387_v24 = vrot.slane %v2037_v13, 4 }
 0x16f   : > { %v544_v26 = vpop.f32.mrb[2].mxu0  ;;  %3264 = vst [vmem:[#allocation5_spill] sm:$0xff] %v2195_v33 }
 0x170   : > { %v546_v27 = vpop.f32.mrb[3].mxu0  ;;  %v2203_v38 = vsub.f32 %v737_v14, %v544_v26 }
 0x171   : > { %v2207_v41 = vsub.f32 %v737_v14, %v546_v27  ;;  %v2261_v27 = vpop.permute.xlu1 %811 }
 0x173   : > { %v550_v28 = vpop.f32.mrb[4].mxu0  ;;  %3265 = vst [vmem:[#allocation6_spill] sm:$0xff] %v2207_v41 }
 0x174   : > { %v2193_v31 = vsub.f32 %v742_v15, %v550_v28  ;;  %v552_v32 = vpop.f32.mrb[5].mxu0 }
 0x175   : > { %v2197_v34 = vsub.f32 %v742_v15, %v552_v32 }
 0x176   : > { %v953_v35 = vmin.f32 %v2191_v30, %v2193_v31 }
 0x177   : > { %v990_v36 = vmin.f32 %v2195_v33, %v2197_v34  ;;  %v556_v37 = vpop.f32.mrb[6].mxu0 }
 0x178   : > { %v2205_v39 = vsub.f32 %v747_v16, %v556_v37  ;;  %v558_v40 = vpop.f32.mrb[7].mxu0  ;;  %v1381_v37 = vadd.f32 %v1380_v23, %v2032_v11 }
 0x179   : > { %v2209_v42 = vsub.f32 %v747_v16, %v558_v40  ;;  %v1388_v40 = vadd.f32 %v1387_v24, %v2037_v13 }
 0x17a   : > { %v954_v44 = vmin.f32 %v2203_v38, %v2205_v39 }
 0x17b   : > { %v991_v45 = vmin.f32 %v2207_v41, %v2209_v42  ;;  %v562_v46 = vpop.f32.mrb[8].mxu0 }
 0x17c   : > { %v2217_v47 = vsub.f32 %v752_v17, %v562_v46  ;;  %v564_v48 = vpop.f32.mrb[9].mxu0  ;;  %v1389_v46 = vrot.slane %v1388_v40, 2 }
 0x17d   : > { %v2219_v49 = vsub.f32 %v752_v17, %v564_v48  ;;  %v2271_v48 = vpop.permute.xlu1 %821 }
 0x17e   : > { %v955_v50 = vmin.f32 %v953_v35, %v2217_v47 }
 0x17f   : > { %v992_v51 = vmin.f32 %v990_v36, %v2219_v49  ;;  %v568_v52 = vpop.f32.mrb[10].mxu0 }
 0x180   : > { %v2225_v54 = vsub.f32 %v757_v18, %v568_v52  ;;  %v570_v55 = vpop.f32.mrb[11].mxu0 }
 0x181   : > { %v2227_v56 = vsub.f32 %v757_v18, %v570_v55  ;;  %v1390_v55 = vadd.f32 %v1389_v46, %v1388_v40 }
 0x182   : > { %v956_v57 = vmin.f32 %v954_v44, %v2225_v54 }
 0x183   : > { %v993_v58 = vmin.f32 %v991_v45, %v2227_v56  ;;  %v574_v59 = vpop.f32.mrb[12].mxu0  ;;  %v1391_v11 = vrot.slane %v1390_v55, 1 }
 0x184   : > { %v2231_v60 = vsub.f32 %v762_v19, %v574_v59  ;;  %v576_v61 = vpop.f32.mrb[13].mxu0 }
 0x185   : > { %v2233_v62 = vsub.f32 %v762_v19, %v576_v61 }
 0x186   : > { %v957_v0 = vmin.f32 %v955_v50, %v2231_v60 }
 0x187   : > { %v994_v1 = vmin.f32 %v992_v51, %v2233_v62  ;;  %v580_v2 = vpop.f32.mrb[14].mxu0 }
 0x188   : > { %v2239_v3 = vsub.f32 %v767_v20, %v580_v2  ;;  %v582_v5 = vpop.f32.mrb[15].mxu0  ;;  %v2280_v2 = vpop.permute.xlu1 %826 }
 0x189   : > { %v2241_v6 = vsub.f32 %v767_v20, %v582_v5 }
 0x18a   : > { %v958_v7 = vmin.f32 %v956_v57, %v2239_v3 }
 0x18b   : > { %v995_v8 = vmin.f32 %v993_v58, %v2241_v6  ;;  %v586_v9 = vpop.f32.mrb[16].mxu0 }
 0x18c   : > { %v2247_v12 = vsub.f32 %v772_v21, %v586_v9  ;;  %v588_v14 = vpop.f32.mrb[17].mxu0 }
 0x18d   : > { %v2249_v15 = vsub.f32 %v772_v21, %v588_v14 }
 0x18e   : > { %v2252_v16 = vmin.f32 %v957_v0, %v2247_v12 }
 0x18f   : > { %v996_v17 = vmin.f32 %v994_v1, %v2249_v15  ;;  %v592_v18 = vpop.f32.mrb[18].mxu0  ;;  %v1392_v1 = vadd.f32 %v1391_v11, %v1390_v55 }
 0x190   : > { %v2255_v19 = vsub.f32 %v777_v22, %v592_v18  ;;  %v594_v20 = vpop.f32.mrb[19].mxu0 }
 0x191   : > { %v2259_v26 = vsub.f32 %v777_v22, %v594_v20  ;;  %v1382_v22 = vrot.slane %v1381_v37, 2  ;;  %v2293_v20 = vpop.permute.xlu1 %831 }
 0x192   : > { %v960_v21 = vmin.f32 %v958_v7, %v2255_v19 }
 0x193   : > { %v997_v28 = vmin.f32 %v995_v8, %v2259_v26  ;;  %v598_v32 = vpop.f32.mrb[20].mxu0  ;;  %v1383_v52 = vadd.f32 %v1382_v22, %v1381_v37 }
 0x194   : > { %v600_v35 = vpop.f32.mrb[21].mxu0 }
 0x195   : > { %v2266_v36 = vsub.f32 %v2187_v25, %v600_v35  ;;  %v1384_v59 = vrot.slane %v1383_v52, 1  ;;  %v837_v35 = vpop.permute.xlu1 %836 }
 0x197   : > { %v998_v44 = vmin.f32 %v996_v17, %v2266_v36  ;;  %v604_v45 = vpop.f32.mrb[22].mxu0  ;;  %v1385_v0 = vadd.f32 %v1384_v59, %v1383_v52  ;;  %v2301_v59 = vsub.f32 %v2187_v25, %v598_v32 }
 0x198   : > { %v606_v50 = vpop.f32.mrb[23].mxu0  ;;  %v2298_v52 = vsub.f32 %v2189_v29, %v604_v45 }
 0x199   : > { %v2274_v51 = vsub.f32 %v2189_v29, %v606_v50  ;;  %v2285_v8 = vadd.f32 %v1392_v1, %v1385_v0  ;;  %v2295_v22 = vpop.permute.xlu1 %841  ;;  %v961_v45 = vmin.f32 %v2252_v16, %v2301_v59 }
 0x19a   : > { %v962_v1 = vmin.f32 %v960_v21, %v2298_v52 }
 0x19b   : > { %v999_v57 = vmin.f32 %v997_v28, %v2274_v51  ;;  %v610_v58 = vpop.f32.mrb[24].mxu0 }
 0x19c   : > { %v612_v61 = vpop.f32.mrb[25].mxu0 }
 0x19d   : > { %v2278_v13 = vsub.f32 %v2211_v43, %v612_v61  ;;  %v817_v61 = vpop.permute.xlu0 %816 }
 0x19f   : > { %v2283_v5 = vmin.f32 %v998_v44, %v2278_v13  ;;  %v616_v7 = vpop.f32.mrb[26].mxu0 }
 0x1a0   : > { %v618_v9 = vpop.f32.mrb[27].mxu0  ;;  %v2304_v11 = vsub.f32 %v2223_v53, %v616_v7 }
 0x1a1   : > { %v2288_v14 = vsub.f32 %v2223_v53, %v618_v9  ;;  %v2308_v9 = vsub.f32 %v2211_v43, %v610_v58 }
 0x1a2   : > { %3266 = vst [vmem:[#allocation7_spill] sm:$0xff] %v2304_v11  ;;  %v964_v25 = vmin.f32 %v962_v1, %v2304_v11 }
 0x1a3   : > { %v2291_v17 = vmin.f32 %v999_v57, %v2288_v14  ;;  %v622_v18 = vpop.f32.mrb[28].mxu0  ;;  %v847_v57 = vpop.permute.xlu1 %846  ;;  %3267 = vst [vmem:[#allocation8_spill] sm:$0xff] %v2308_v9  ;;  %v963_v21 = vmin.f32 %v961_v45, %v2308_v9 }
 0x1a4   : > { %v624_v23 = vpop.f32.mrb[29].mxu0  ;;  %v2317_v32 = vsub.f32 %v2235_v63, %v622_v18 }
 0x1a6   : > { %3269 = vst [vmem:[#allocation10_spill] sm:$0xff] %v2317_v32  ;;  %v965_v1 = vmin.f32 %v963_v21, %v2317_v32 }
 0x1a7   : > { %v628_v24 = vpop.f32.mrb[30].mxu0  ;;  %v852_v16 = vpop.permute.xlu1 %851 }
 0x1a8   : > { %v630_v28 = vpop.f32.mrb[31].mxu0  ;;  %v2311_v4 = vsub.f32 %v2245_v10, %v628_v24 }
 0x1aa   : > { %3268 = vst [vmem:[#allocation9_spill] sm:$0xff] %v2311_v4  ;;  %v966_v43 = vmin.f32 %v964_v25, %v2311_v4 }
 0x1ab   : > { %v634_v37 = vpop.f32.mrb[32].mxu0  ;;  %v857_v32 = vpop.permute.xlu1 %856 }
 0x1ac   : > { %v636_v40 = vpop.f32.mrb[33].mxu0  ;;  %v2324_v58 = vsub.f32 %v2261_v27, %v634_v37 }
 0x1ae   : > { %3271 = vst [vmem:[#allocation12_spill] sm:$0xff] %v2324_v58  ;;  %v967_v45 = vmin.f32 %v965_v1, %v2324_v58 }
 0x1af   : > { %v640_v44 = vpop.f32.mrb[34].mxu0  ;;  %v862_v58 = vpop.permute.xlu1 %861 }
 0x1b0   : > { %v642_v46 = vpop.f32.mrb[35].mxu0  ;;  %v2319_v53 = vsub.f32 %v817_v61, %v640_v44 }
 0x1b2   : > { %3270 = vst [vmem:[#allocation11_spill] sm:$0xff] %v2319_v53  ;;  %v968_v18 = vmin.f32 %v966_v43, %v2319_v53 }
 0x1b3   : > { %v646_v50 = vpop.f32.mrb[36].mxu0 }
 0x1b4   : > { %v648_v55 = vpop.f32.mrb[37].mxu0  ;;  %v2332_v44 = vsub.f32 %v2271_v48, %v646_v50 }
 0x1b6   : > { %3273 = vst [vmem:[#allocation14_spill] sm:$0xff] %v2332_v44  ;;  %v969_v9 = vmin.f32 %v967_v45, %v2332_v44 }
 0x1b7   : > { %v652_v0 = vpop.f32.mrb[38].mxu0 }
 0x1b8   : > { %v654_v29 = vpop.f32.mrb[39].mxu0  ;;  %v2327_v24 = vsub.f32 %v2280_v2, %v652_v0 }
 0x1ba   : > { %3272 = vst [vmem:[#allocation13_spill] sm:$0xff] %v2327_v24  ;;  %v970_v25 = vmin.f32 %v968_v18, %v2327_v24  ;;  %v2348_v18 = vsub.f32 %v2245_v10, %v630_v28  ;;  %v2354_v24 = vsub.f32 %v817_v61, %v642_v46  ;;  %v2364_v10 = vsub.f32 %v2280_v2, %v654_v29 }
 0x1bb   : > { %v658_v7 = vpop.f32.mrb[40].mxu0  ;;  %v2371_v46 = vsub.f32 %v2271_v48, %v648_v55 }
 0x1bc   : > { %v660_v41 = vpop.f32.mrb[41].mxu0  ;;  %v2337_v37 = vsub.f32 %v2293_v20, %v658_v7  ;;  %3274 = vst [vmem:[#allocation15_spill] sm:$0xff] %v2348_v18  ;;  %3276 = vst [vmem:[#allocation17_spill] sm:$0xff] %v2354_v24 }
 0x1bd   : > { %3278 = vst [vmem:[#allocation19_spill] sm:$0xff] %v2364_v10  ;;  %3279 = vst [vmem:[#allocation20_spill] sm:$0xff] %v2371_v46  ;;  %v2380_v29 = vsub.f32 %v2293_v20, %v660_v41 }
 0x1be   : > { %v971_v50 = vmin.f32 %v969_v9, %v2337_v37  ;;  %v1003_v9 = vmin.f32 %v2291_v17, %v2348_v18 }
 0x1bf   : > { %v664_v11 = vpop.f32.mrb[42].mxu0  ;;  %3281 = vst [vmem:[#allocation22_spill] sm:$0xff] %v2380_v29 }
 0x1c0   : > { %v2339_v4 = vsub.f32 %v837_v35, %v664_v11  ;;  %v666_v0 = vpop.f32.mrb[43].mxu0  ;;  %v2352_v11 = vsub.f32 %v2235_v63, %v624_v23  ;;  %v1005_v23 = vmin.f32 %v1003_v9, %v2354_v24 }
 0x1c1   : > { %v2373_v61 = vsub.f32 %v837_v35, %v666_v0 }
 0x1c2   : > { %v972_v21 = vmin.f32 %v970_v25, %v2339_v4  ;;  %3275 = vst [vmem:[#allocation16_spill] sm:$0xff] %v2352_v11  ;;  %v1002_v63 = vmin.f32 %v2283_v5, %v2352_v11  ;;  %v1007_v2 = vmin.f32 %v1005_v23, %v2364_v10 }
 0x1c3   : > { %v670_v43 = vpop.f32.mrb[44].mxu0  ;;  %3280 = vst [vmem:[#allocation21_spill] sm:$0xff] %v2373_v61 }
 0x1c4   : > { %v2345_v53 = vsub.f32 %v2295_v22, %v670_v43  ;;  %v672_v1 = vpop.f32.mrb[45].mxu0  ;;  %v2361_v43 = vsub.f32 %v2261_v27, %v636_v40  ;;  %v1009_v35 = vmin.f32 %v1007_v2, %v2373_v61 }
 0x1c5   : > { %v2388_v55 = vsub.f32 %v2295_v22, %v672_v1 }
 0x1c6   : > { %v973_v7 = vmin.f32 %v971_v50, %v2345_v53  ;;  %3277 = vst [vmem:[#allocation18_spill] sm:$0xff] %v2361_v43  ;;  %v1004_v40 = vmin.f32 %v1002_v63, %v2361_v43 }
 0x1c7   : > { %v676_v45 = vpop.f32.mrb[46].mxu0  ;;  %3283 = vst [vmem:[#allocation24_spill] sm:$0xff] %v2388_v55 }
 0x1c8   : > { %v2356_v25 = vsub.f32 %v847_v57, %v676_v45  ;;  %v678_v44 = vpop.f32.mrb[47].mxu0  ;;  %v867_v45 = vpop.permute.xlu1 %866  ;;  %v1006_v48 = vmin.f32 %v1004_v40, %v2371_v46 }
 0x1ca   : > { %v974_v28 = vmin.f32 %v972_v21, %v2356_v25  ;;  %v2382_v21 = vsub.f32 %v847_v57, %v678_v44  ;;  %v1008_v23 = vmin.f32 %v1006_v48, %v2380_v29 }
 0x1cb   : > { %v682_v50 = vpop.f32.mrb[48].mxu0 }
 0x1cc   : > { %v2375_v17 = vsub.f32 %v852_v16, %v682_v50  ;;  %v684_v27 = vpop.f32.mrb[49].mxu0  ;;  %3282 = vst [vmem:[#allocation23_spill] sm:$0xff] %v2382_v21  ;;  %v1011_v41 = vmin.f32 %v1009_v35, %v2382_v21  ;;  %v872_v2 = vpop.permute.xlu1 %871 }
 0x1cd   : > { %v2394_v20 = vsub.f32 %v852_v16, %v684_v27 }
 0x1ce   : > { %v975_v5 = vmin.f32 %v973_v7, %v2375_v17  ;;  %v1010_v7 = vmin.f32 %v1008_v23, %v2388_v55 }
 0x1cf   : > { %v688_v0 = vpop.f32.mrb[50].mxu0 }
 0x1d0   : > { %v2390_v9 = vsub.f32 %v857_v32, %v688_v0  ;;  %v690_v63 = vpop.f32.mrb[51].mxu0  ;;  %v1012_v0 = vmin.f32 %v1010_v7, %v2394_v20 }
 0x1d1   : > { %v2396_v57 = vsub.f32 %v857_v32, %v690_v63 }
 0x1d2   : > { %v976_v44 = vmin.f32 %v974_v28, %v2390_v9 }
 0x1d3   : > { %v1013_v50 = vmin.f32 %v1011_v41, %v2396_v57  ;;  %v694_v22 = vpop.f32.mrb[52].mxu0  ;;  %v877_v41 = vpop.permute.xlu1 %876 }
 0x1d4   : > { %v2401_v1 = vsub.f32 %v862_v58, %v694_v22  ;;  %v696_v40 = vpop.f32.mrb[53].mxu0 }
 0x1d5   : > { %v2404_v48 = vsub.f32 %v862_v58, %v696_v40 }
 0x1d6   : > { %v977_v16 = vmin.f32 %v975_v5, %v2401_v1 }
 0x1d7   : > { %v1014_v32 = vmin.f32 %v1012_v0, %v2404_v48  ;;  %v700_v27 = vpop.f32.mrb[54].mxu0 }
 0x1d8   : > { %v2408_v35 = vsub.f32 %v867_v45, %v700_v27  ;;  %v702_v28 = vpop.f32.mrb[55].mxu0 }
 0x1d9   : > { %v2410_v63 = vsub.f32 %v867_v45, %v702_v28  ;;  %v882_v28 = vpop.permute.xlu1 %881 }
 0x1da   : > { %v978_v23 = vmin.f32 %v976_v44, %v2408_v35 }
 0x1db   : > { %v1015_v22 = vmin.f32 %v1013_v50, %v2410_v63  ;;  %v706_v21 = vpop.f32.mrb[56].mxu0 }
 0x1dc   : > { %v2414_v55 = vsub.f32 %v872_v2, %v706_v21  ;;  %v708_v58 = vpop.f32.mrb[57].mxu0 }
 0x1dd   : > { %v2416_v7 = vsub.f32 %v872_v2, %v708_v58 }
 0x1de   : > { %v979_v5 = vmin.f32 %v977_v16, %v2414_v55 }
 0x1df   : > { %v1016_v40 = vmin.f32 %v1014_v32, %v2416_v7  ;;  %v712_v0 = vpop.f32.mrb[58].mxu0  ;;  %v887_v32 = vpop.permute.xlu1 %886 }
 0x1e0   : > { %v2420_v27 = vsub.f32 %v877_v41, %v712_v0  ;;  %v714_v45 = vpop.f32.mrb[59].mxu0 }
 0x1e1   : > { %v2422_v61 = vsub.f32 %v877_v41, %v714_v45 }
 0x1e2   : > { %v980_v44 = vmin.f32 %v978_v23, %v2420_v27 }
 0x1e3   : > { %v1017_v50 = vmin.f32 %v1015_v22, %v2422_v61  ;;  %v718_v21 = vpop.f32.mrb[60].mxu0 }
 0x1e4   : > { %v2426_v29 = vsub.f32 %v882_v28, %v718_v21  ;;  %v720_v2 = vpop.f32.mrb[61].mxu0 }
 0x1e5   : > { %v2428_v58 = vsub.f32 %v882_v28, %v720_v2 }
 0x1e6   : > { %v981_v16 = vmin.f32 %v979_v5, %v2426_v29 }
 0x1e7   : > { %3284 = vst [vmem:[#allocation25_spill] sm:$0xff] %v2428_v58  ;;  %v1018_v0 = vmin.f32 %v1016_v40, %v2428_v58  ;;  %v724_v10 = vpop.f32.mrb[62].mxu0 }
 0x1e8   : > { %v2432_v46 = vsub.f32 %v887_v32, %v724_v10  ;;  %v726_v41 = vpop.f32.mrb[63].mxu0 }
 0x1e9   : > { %v2434_v45 = vsub.f32 %v887_v32, %v726_v41  ;;  %v3300_v41 = vmov 0.0  }
 0x1ea   : > { %v982_v23 = vmin.f32 %v980_v44, %v2432_v46 }
 0x1eb   : > { %3285 = vst [vmem:[#allocation26_spill] sm:$0xff] %v2434_v45  ;;  %v1019_v22 = vmin.f32 %v1017_v50, %v2434_v45 }
 0x1ec   : > { %v983_v21 = vmin.f32 %v981_v16, %v982_v23  ;;  %v3296_v16 = vmov 0 }
 0x1ed   : > { %v1020_v24 = vmin.f32 %v1018_v0, %v1019_v22  ;;  %v3298_v0 = vmov 0 }
 0x1ee   : > { %v984_v43 = vrot.slane %v983_v21, 4 }
 0x1ef   : > { %v1021_v2 = vrot.slane %v1020_v24, 4 }
 0x1f0   : > { %v985_v28 = vmin.f32 %v983_v21, %v984_v43  ;;  %v3304_v21 = vmov 0 }
 0x1f1   : > { %v1022_v11 = vmin.f32 %v1020_v24, %v1021_v2 }
 0x1f2   : > { %v986_v18 = vrot.slane %v985_v28, 2 }
 0x1f3   : > { %v1023_v10 = vrot.slane %v1022_v11, 2 }
 0x1f4   : > { %v987_v5 = vmin.f32 %v985_v28, %v986_v18  ;;  %v3310_v28 = vmov 0 }
 0x1f5   : > { %v1024_v43 = vmin.f32 %v1022_v11, %v1023_v10 }
 0x1f6   : > { %v988_v33 = vrot.slane %v987_v5, 1 }
 0x1f7   : > { %v1025_v50 = vrot.slane %v1024_v43, 1 }
 0x1f8   : > { %v2438_v40 = vmin.f32 %v987_v5, %v988_v33 }
 0x1f9   : > { %v2544_v32 = vmin.f32 %v1024_v43, %v1025_v50 }
 0x1fa   : > { %vm1027_vm2 = vcmp.eq.f32.partialorder %v2191_v30, %v2438_v40  ;;  %vm3243_vm3 = vcmp.eq.f32.partialorder %v2203_v38, %v2438_v40  ;;  %vm3242_vm4 = vcmp.eq.f32.partialorder %v2193_v31, %v2438_v40  ;;  %vm3241_vm5 = vcmp.eq.f32.partialorder %v2205_v39, %v2438_v40 }
 0x1fb   : > { %vm3238_vm6 = vcmp.eq.f32.partialorder %v2217_v47, %v2438_v40  ;;  %vm3237_vm7 = vcmp.eq.f32.partialorder %v2225_v54, %v2438_v40  ;;  %vm3240_vm8 = vcmp.eq.f32.partialorder %v2231_v60, %v2438_v40  ;;  %vm3239_vm9 = vcmp.eq.f32.partialorder %v2239_v3, %v2438_v40  ;;  %vm2462_vm10 = vmpackc.low %vm3243_vm3, %vm1027_vm2 }
 0x1fc   : > { %vm3245_vm11 = vcmp.eq.f32.partialorder %v2247_v12, %v2438_v40  ;;  %vm3244_vm12 = vcmp.eq.f32.partialorder %v2255_v19, %v2438_v40  ;;  %vm2476_vm13 = vmpackc.low %vm3241_vm5, %vm3242_vm4  ;;  %vm3246_vm0 = vcmp.eq.f32.partialorder %v2339_v4, %v2438_v40  ;;  %vm3251_vm1 = vcmp.eq.f32.partialorder %v2345_v53, %v2438_v40 }
 0x1fd   : > { %vm2486_vm14 = vmpackc.low %vm3237_vm7, %vm3238_vm6  ;;  %vm3248_vm7 = vcmp.eq.f32.partialorder %v2356_v25, %v2438_v40  ;;  %vm3250_vm5 = vcmp.eq.f32.partialorder %v2401_v1, %v2438_v40  ;;  %vm3249_vm4 = vcmp.eq.f32.partialorder %v2408_v35, %v2438_v40  ;;  %v1580_v23 = vsel %vm1027_vm2, 1.0, %v3300_v41 }
 0x1fe   : > { %vm2496_vm15 = vmpackc.low %vm3239_vm9, %vm3240_vm8  ;;  %vm3247_vm8 = vcmp.eq.f32.partialorder %v2337_v37, %v2438_v40  ;;  %v3306_v30 = vmov 0 }
 0x1ff   : > { %vm2512_vm6 = vmpackc.low %vm3244_vm12, %vm3245_vm11  ;;  %vm3252_vm12 = vcmp.eq.f32.partialorder %v2420_v27, %v2438_v40  ;;  %vm3303_vm11 = vcmp.eq.f32.partialorder %v2390_v9, %v2438_v40 }
 0x200   : > { %vm2540_vm3 = vmpackc.low %vm3246_vm0, %vm3247_vm8  ;;  %vm3301_vm0 = vcmp.eq.f32.partialorder %v2203_v38, %v2438_v40  ;;  %vm3302_vm8 = vcmp.eq.f32.partialorder %v2375_v17, %v2438_v40 }
 0x201   : > { %v3297_v16 = vsel %vm2540_vm3, 4294967295, %v3296_v16  ;;  %vm2552_vm9 = vmpackc.low %vm3248_vm7, %vm3251_vm1  ;;  %v1582_v22 = vsel %vm3301_vm0, 1.0, %v3300_v41  ;;  %vm3308_vm0 = vcmp.eq.f32.partialorder %v2193_v31, %v2438_v40  ;;  %vm3313_vm1 = vcmp.eq.f32.partialorder %v2426_v29, %v2438_v40 }
 0x202   : > { %v3299_v0 = vsel %vm2552_vm9, 4294967295, %v3298_v0  ;;  %vm2570_vm7 = vmpackc.low %vm3303_vm11, %vm3302_vm8  ;;  %v1584_v38 = vsel %vm3308_vm0, 1.0, %v3300_v41  ;;  %vm3309_vm8 = vcmp.eq.f32.partialorder %v2414_v55, %v2438_v40  ;;  %v1219_v2 = vadd.f32 %v1582_v22, %v1580_v23 }
 0x203   : > { %v3305_v21 = vsel %vm2570_vm7, 4294967295, %v3304_v21  ;;  %vm2580_vm2 = vmpackc.low %vm3249_vm4, %vm3250_vm5  ;;  %v3315_v31 = vmov 0  ;;  %vm3253_vm4 = vcmp.eq.f32.partialorder %v2219_v49, %v2544_v32  ;;  %vm3326_vm7 = vcmp.eq.f32.partialorder %v2233_v62, %v2544_v32 }
 0x204   : > { %v3307_v30 = vsel %vm2580_vm2, 4294967295, %v3306_v30  ;;  %vm2594_vm11 = vmpackc.low %vm3252_vm12, %vm3309_vm8  ;;  %vm3314_vm2 = vcmp.eq.f32.partialorder %v2432_v46, %v2438_v40  ;;  %vm3318_vm12 = vcmp.eq.f32.partialorder %v2205_v39, %v2438_v40  ;;  %v1220_v39 = vadd.f32 %v1584_v38, %v1219_v2 }
 0x205   : > { %v3311_v28 = vsel %vm2594_vm11, 4294967295, %v3310_v28  ;;  %vm2610_vm8 = vmpackc.low %vm3314_vm2, %vm3313_vm1  ;;  %v1586_v5 = vsel %vm3318_vm12, 1.0, %v3300_v41  ;;  %vm3319_vm1 = vcmp.eq.f32.partialorder %v2197_v34, %v2544_v32  ;;  %vm3320_vm2 = vcmp.eq.f32.partialorder %v2209_v42, %v2544_v32 }
 0x206   : > { %3312 = vst [vmem:[#allocation27_spill] sm:$0xff] %v3311_v28  ;;  %v3316_v31 = vsel %vm2610_vm8, 4294967295, %v3315_v31  ;;  %vm2630_vm8 = vmpackc.low %vm3320_vm2, %vm3319_vm1  ;;  %vm3323_vm11 = vcmp.eq.f32.partialorder %v2227_v56, %v2544_v32  ;;  %v1221_v23 = vadd.f32 %v1586_v5, %v1220_v39  ;;  %vm3330_vm12 = vcmp.eq.f32.partialorder %v2249_v15, %v2544_v32 }
 0x207   : > { %3317 = vst [vmem:[#allocation28_spill] sm:$0xff] %v3316_v31  ;;  %vm2646_vm1 = vmpackc.low %vm3323_vm11, %vm3253_vm4  ;;  %vm3327_vm11 = vcmp.eq.f32.partialorder %v2241_v6, %v2544_v32  ;;  %vm3331_vm0 = vcmp.eq.f32.partialorder %v2259_v26, %v2544_v32  ;;  %vm3334_vm5 = vcmp.eq.f32.partialorder %v2217_v47, %v2438_v40  ;;  %v3337_v2 = vmov 0 }
 0x208   : > { %vm2664_vm4 = vmpackc.low %vm3327_vm11, %vm3326_vm7  ;;  %v1588_v38 = vsel %vm3334_vm5, 1.0, %v3300_v41  ;;  %vm3335_vm7 = vcmp.eq.f32.partialorder %v2266_v36, %v2544_v32  ;;  %vm3336_vm11 = vcmp.eq.f32.partialorder %v2274_v51, %v2544_v32  ;;  %v3341_v47 = vmov 0 }
 0x209   : > { %vm2674_vm2 = vmpackc.low %vm3331_vm0, %vm3330_vm12  ;;  %v1222_v5 = vadd.f32 %v1588_v38, %v1221_v23  ;;  %vm3339_vm0 = vcmp.eq.f32.partialorder %v2278_v13, %v2544_v32  ;;  %vm3340_vm12 = vcmp.eq.f32.partialorder %v2288_v14, %v2544_v32  ;;  %vm3343_vm5 = vcmp.eq.f32.partialorder %v2225_v54, %v2438_v40 }
 0x20a   : > { %vm2688_vm9 = vmpackc.low %vm3336_vm11, %vm3335_vm7  ;;  %v1590_v39 = vsel %vm3343_vm5, 1.0, %v3300_v41  ;;  %vm3255_vm7 = vcmp.eq.f32.partialorder %v2396_v57, %v2544_v32  ;;  %vm3344_vm5 = vcmp.eq.f32.partialorder %v2231_v60, %v2438_v40  ;;  %vm3256_vm11 = vcmp.eq.f32.partialorder %v2394_v20, %v2544_v32 }
 0x20b   : > { %v3338_v2 = vsel %vm2688_vm9, 4294967295, %v3337_v2  ;;  %vm2698_vm3 = vmpackc.low %vm3340_vm12, %vm3339_vm0  ;;  %vm3257_vm9 = vcmp.eq.f32.partialorder %v2410_v63, %v2544_v32  ;;  %v1223_v23 = vadd.f32 %v1590_v39, %v1222_v5  ;;  %v1592_v54 = vsel %vm3344_vm5, 1.0, %v3300_v41 }
 0x20c   : > { %v3342_v47 = vsel %vm2698_vm3, 4294967295, %v3341_v47  ;;  %v1396_v38 = vadd.f32 %v2544_v32, %v2438_v40  ;;  %vm3345_vm0 = vcmp.eq.f32.partialorder %v2239_v3, %v2438_v40  ;;  %vm2736_vm5 = vmpackc.low %vm3255_vm7, %vm3256_vm11  ;;  %v3346_v60 = vmov 0 }
 0x20d   : > { %v1224_v5 = vadd.f32 %v1592_v54, %v1223_v23  ;;  %v1594_v39 = vsel %vm3345_vm0, 1.0, %v3300_v41  ;;  %v3347_v60 = vsel %vm2736_vm5, 4294967295, %v3346_v60  ;;  %vm3348_vm3 = vcmp.eq.f32.partialorder %v2247_v12, %v2438_v40 }
 0x20e   : > { %1397 = vadd.xlane.f32.xlu1 %v1396_v38  ;;  %v1596_v23 = vsel %vm3348_vm3, 1.0, %v3300_v41  ;;  %vm3349_vm0 = vcmp.eq.f32.partialorder %v2404_v48, %v2544_v32  ;;  %v3350_v3 = vmov 0  ;;  %vm3352_vm11 = vcmp.eq.f32.partialorder %v2416_v7, %v2544_v32 }
 0x20f   : > { %v1225_v31 = vadd.f32 %v1594_v39, %v1224_v5  ;;  %vm2750_vm12 = vmpackc.low %vm3257_vm9, %vm3349_vm0  ;;  %vm3353_vm3 = vcmp.eq.f32.partialorder %v2422_v61, %v2544_v32  ;;  %v3354_v12 = vmov 0  ;;  %vm3356_vm0 = vcmp.eq.f32.partialorder %v2255_v19, %v2438_v40  ;;  %v3364_v39 = vld [vmem:[#allocation6_spill] sm:$0xff] }
 0x210   : > { %v3351_v3 = vsel %vm2750_vm12, 4294967295, %v3350_v3  ;;  %vm2762_vm5 = vmpackc.low %vm3353_vm3, %vm3352_vm11  ;;  %v1598_v38 = vsel %vm3356_vm0, 1.0, %v3300_v41  ;;  %vm3357_vm9 = vcmp.eq.f32.partialorder %v2428_v58, %v2544_v32  ;;  %vm3358_vm7 = vcmp.eq.f32.partialorder %v2434_v45, %v2544_v32 }
 0x211   : > { %v1226_v54 = vadd.f32 %v1596_v23, %v1225_v31  ;;  %v3355_v12 = vsel %vm2762_vm5, 4294967295, %v3354_v12  ;;  %vm2777_vm12 = vmpackc.low %vm3358_vm7, %vm3357_vm9  ;;  %v3359_v31 = vmov 0  ;;  %vm1049_vm11 = vcmp.eq.f32.partialorder %v2298_v52, %v2438_v40  ;;  %v3365_v23 = vld [vmem:[#allocation8_spill] sm:$0xff] }
 0x212   : > { %1394 = vadd.xlane.f32.xlu1 %v2285_v8  ;;  %v3360_v31 = vsel %vm2777_vm12, 4294967295, %v3359_v31  ;;  %vm3362_vm3 = vcmp.eq.f32.partialorder %v2301_v59, %v2438_v40  ;;  %v3363_v8 = vld [vmem:[#allocation5_spill] sm:$0xff]  ;;  %vm1030_vm5 = vcmp.eq.f32.partialorder %v3364_v39, %v2544_v32  ;;  %v1928_v58 = vmov 1.0|1.0  }
 0x213   : > { %3361 = vst [vmem:[#allocation29_spill] sm:$0xff] %v3360_v31  ;;  %v1227_v5 = vadd.f32 %v1598_v38, %v1226_v54  ;;  %v1600_v19 = vsel %vm3362_vm3, 1.0, %v3300_v41  ;;  %vm1028_vm0 = vcmp.eq.f32.partialorder %v3363_v8, %v2544_v32  ;;  %v1583_v28 = vsel %vm1030_vm5, 1.0, %v3300_v41  ;;  %v3366_v8 = vld [vmem:[#allocation7_spill] sm:$0xff] }
 0x214   : > { %v1581_v31 = vsel %vm1028_vm0, 1.0, %v3300_v41  ;;  %vm1715_vm7 = vmpackc.low %vm1030_vm5, %vm1028_vm0  ;;  %v1602_v54 = vsel %vm1049_vm11, 1.0, %v3300_v41  ;;  %vm1053_vm3 = vcmp.eq.f32.partialorder %v3366_v8, %v2438_v40  ;;  %vm3367_vm9 = vcmp.eq.f32.partialorder %v2197_v34, %v2544_v32 }
 0x215   : > { %v1228_v45 = vadd.f32 %v1600_v19, %v1227_v5  ;;  %v1256_v38 = vadd.f32 %v1583_v28, %v1581_v31  ;;  %1716 = vmatprep.subr.msk.bf16.mxu1 %vm1715_vm7, %v1928_v58  ;;  %v1585_v5 = vsel %vm3367_vm9, 1.0, %v3300_v41  ;;  %vm3368_vm5 = vcmp.eq.f32.partialorder %v3365_v23, %v2438_v40 }
 0x216   : > { %1718 = vmatpush1.bf16.msk.msra.mxu1 %vm2462_vm10, %v1928_v58  ;;  %v1604_v28 = vsel %vm3368_vm5, 1.0, %v3300_v41  ;;  %vm3370_vm9 = vcmp.eq.f32.partialorder %v2209_v42, %v2544_v32  ;;  %v1606_v19 = vsel %vm1053_vm3, 1.0, %v3300_v41  ;;  %vm265_vm7 = vcmask 0  }
 0x217   : > { %v1229_v39 = vadd.f32 %v1602_v54, %v1228_v45  ;;  %v1257_v31 = vadd.f32 %v1585_v5, %v1256_v38  ;;  %1720 = vmatprep.subr.msk.bf16.mxu1 %vm2630_vm8, %v1928_v58  ;;  %v3369_v45 = vld [vmem:[#allocation10_spill] sm:$0xff]  ;;  %v1587_v33 = vsel %vm3370_vm9, 1.0, %v3300_v41  ;;  %v3371_v38 = vld [vmem:[#allocation9_spill] sm:$0xff]  ;;  %vm3372_vm8 = vcmp.eq.f32.partialorder %v2219_v49, %v2544_v32  ;;  %v3373_v49 = vld [vmem:[#allocation12_spill] sm:$0xff]  ;;  %266 = vst.msk [vmem:[%s2846_s22] sm:$0x1] %vm265_vm7, %v3300_v41 }
 0x218   : > { %vm1055_vm0 = vcmp.eq.f32.partialorder %v3369_v45, %v2438_v40  ;;  %vm1057_vm10 = vcmp.eq.f32.partialorder %v3371_v38, %v2438_v40  ;;  %vm3374_vm5 = vcmp.eq.f32.partialorder %v2227_v56, %v2544_v32  ;;  %vm3376_vm9 = vcmp.eq.f32.partialorder %v2233_v62, %v2544_v32  ;;  %v3401_v45 = vld [vmem:[#allocation20_spill] sm:$0xff]  ;;  %v3402_v38 = vld [vmem:[#allocation19_spill] sm:$0xff] }
 0x219   : > { %v1230_v34 = vadd.f32 %v1604_v28, %v1229_v39  ;;  %v1258_v54 = vadd.f32 %v1587_v33, %v1257_v31  ;;  %v1589_v39 = vsel %vm3372_vm8, 1.0, %v3300_v41  ;;  %v1608_v42 = vsel %vm1055_vm0, 1.0, %v3300_v41 }
 0x21a   : > { %1722 = vmatpush1.bf16.msk.msra.mxu1 %vm2476_vm13, %v1928_v58  ;;  %vm1059_vm13 = vcmp.eq.f32.partialorder %v3373_v49, %v2438_v40  ;;  %v1591_v28 = vsel %vm3374_vm5, 1.0, %v3300_v41  ;;  %v1610_v43 = vsel %vm1057_vm10, 1.0, %v3300_v41  ;;  %vm3378_vm5 = vcmp.eq.f32.partialorder %v2241_v6, %v2544_v32  ;;  %v3405_v49 = vld [vmem:[#allocation22_spill] sm:$0xff] }
 0x21b   : > { %v1231_v10 = vadd.f32 %v1606_v19, %v1230_v34  ;;  %v1259_v5 = vadd.f32 %v1589_v39, %v1258_v54  ;;  %1724 = vmatprep.subr.msk.bf16.mxu1 %vm2646_vm1, %v1928_v58  ;;  %v3375_v34 = vld [vmem:[#allocation11_spill] sm:$0xff]  ;;  %v1593_v19 = vsel %vm3376_vm9, 1.0, %v3300_v41  ;;  %v1612_v56 = vsel %vm1059_vm13, 1.0, %v3300_v41 }
 0x21c   : > { %vm1061_vm1 = vcmp.eq.f32.partialorder %v3375_v34, %v2438_v40  ;;  %v1595_v62 = vsel %vm3378_vm5, 1.0, %v3300_v41  ;;  %vm3381_vm9 = vcmp.eq.f32.partialorder %v2259_v26, %v2544_v32  ;;  %vm3384_vm5 = vnez %v3338_v2  ;;  %v3390_v2 = vld [vmem:[#allocation16_spill] sm:$0xff]  ;;  %v3406_v34 = vld [vmem:[#allocation21_spill] sm:$0xff] }
 0x21d   : > { %v1232_v24 = vadd.f32 %v1608_v42, %v1231_v10  ;;  %v1260_v31 = vadd.f32 %v1591_v28, %v1259_v5  ;;  %v3377_v10 = vld [vmem:[#allocation14_spill] sm:$0xff]  ;;  %v1614_v18 = vsel %vm1061_vm1, 1.0, %v3300_v41  ;;  %v3379_v5 = vld [vmem:[#allocation13_spill] sm:$0xff] }
 0x21e   : > { %1726 = vmatpush1.bf16.msk.msra.mxu1 %vm2486_vm14, %v1928_v58  ;;  %vm1063_vm8 = vcmp.eq.f32.partialorder %v3377_v10, %v2438_v40  ;;  %vm1065_vm14 = vcmp.eq.f32.partialorder %v3379_v5, %v2438_v40  ;;  %v3409_v10 = vld [vmem:[#allocation24_spill] sm:$0xff]  ;;  %v3410_v5 = vld [vmem:[#allocation23_spill] sm:$0xff] }
 0x21f   : > { %v1233_v33 = vadd.f32 %v1610_v43, %v1232_v24  ;;  %v1261_v54 = vadd.f32 %v1593_v19, %v1260_v31  ;;  %1728 = vmatprep.subr.msk.bf16.mxu1 %vm2664_vm4, %v1928_v58  ;;  %vm3380_vm4 = vcmp.eq.f32.partialorder %v2249_v15, %v2544_v32  ;;  %v1616_v6 = vsel %vm1063_vm8, 1.0, %v3300_v41 }
 0x220   : > { %v1597_v24 = vsel %vm3380_vm4, 1.0, %v3300_v41  ;;  %v1599_v15 = vsel %vm3381_vm9, 1.0, %v3300_v41  ;;  %v1618_v44 = vsel %vm1065_vm14, 1.0, %v3300_v41  ;;  %vm3385_vm4 = vcmp.eq.f32.partialorder %v2274_v51, %v2544_v32 }
 0x221   : > { %v1234_v39 = vadd.f32 %v1612_v56, %v1233_v33  ;;  %v1262_v42 = vadd.f32 %v1595_v62, %v1261_v54  ;;  %vm3387_vm9 = vcmp.eq.f32.partialorder %v2301_v59, %v2438_v40  ;;  %v3391_v59 = vld [vmem:[#allocation15_spill] sm:$0xff] }
 0x222   : > { %1730 = vmatpush1.bf16.msk.msra.mxu1 %vm2496_vm15, %v1928_v58  ;;  %vm3382_vm15 = vcmp.eq.f32.partialorder %v2266_v36, %v2544_v32  ;;  %v1603_v36 = vsel %vm3385_vm4, 1.0, %v3300_v41  ;;  %vm1056_vm4 = vcmp.eq.f32.partialorder %v3390_v2, %v2544_v32 }
 0x223   : > { %v1235_v50 = vadd.f32 %v1614_v18, %v1234_v39  ;;  %v1263_v28 = vadd.f32 %v1597_v24, %v1262_v42  ;;  %1732 = vmatprep.subr.msk.bf16.mxu1 %vm2674_vm2, %v1928_v58  ;;  %v1601_v19 = vsel %vm3382_vm15, 1.0, %v3300_v41  ;;  %vm3383_vm2 = vcmp.eq.f32.partialorder %v2337_v37, %v2438_v40  ;;  %vm1737_vm15 = vmpackc.low %vm1049_vm11, %vm3387_vm9 }
 0x224   : > { %v1620_v26 = vsel %vm3383_vm2, 1.0, %v3300_v41  ;;  %vm3388_vm2 = vcmp.eq.f32.partialorder %v2278_v13, %v2544_v32  ;;  %vm3392_vm11 = vnez %v3342_v47  ;;  %vm3393_vm9 = vcmp.eq.f32.partialorder %v2288_v14, %v2544_v32 }
 0x225   : > { %v1236_v43 = vadd.f32 %v1616_v6, %v1235_v50  ;;  %v1264_v31 = vadd.f32 %v1599_v15, %v1263_v28  ;;  %v1605_v51 = vsel %vm3388_vm2, 1.0, %v3300_v41  ;;  %v1607_v39 = vsel %vm3393_vm9, 1.0, %v3300_v41 }
 0x226   : > { %1734 = vmatpush1.bf16.msk.msra.mxu1 %vm2512_vm6, %v1928_v58  ;;  %vm3386_vm6 = vcmp.eq.f32.partialorder %v2339_v4, %v2438_v40  ;;  %vm3395_vm2 = vcmp.eq.f32.partialorder %v3365_v23, %v2438_v40  ;;  %v1609_v18 = vsel %vm1056_vm4, 1.0, %v3300_v41  ;;  %vm3396_vm9 = vcmp.eq.f32.partialorder %v2375_v17, %v2438_v40  ;;  %v3398_v23 = vld [vmem:[#allocation17_spill] sm:$0xff] }
 0x227   : > { %v1237_v33 = vadd.f32 %v1618_v44, %v1236_v43  ;;  %v1265_v22 = vadd.f32 %v1601_v19, %v1264_v31  ;;  %1736 = vmatprep.subr.msk.bf16.mxu1 %vm3384_vm5, %v1928_v58  ;;  %v1622_v11 = vsel %vm3386_vm6, 1.0, %v3300_v41  ;;  %vm3389_vm5 = vcmp.eq.f32.partialorder %v2345_v53, %v2438_v40 }
 0x228   : > { %v1624_v4 = vsel %vm3389_vm5, 1.0, %v3300_v41  ;;  %vm1058_vm6 = vcmp.eq.f32.partialorder %v3391_v59, %v2544_v32  ;;  %vm1741_vm5 = vmpackc.low %vm1053_vm3, %vm3395_vm2  ;;  %v1628_v14 = vsel %vm3396_vm9, 1.0, %v3300_v41  ;;  %vm1062_vm3 = vcmp.eq.f32.partialorder %v3398_v23, %v2544_v32  ;;  %v3432_v23 = vld [vmem:[#allocation28_spill] sm:$0xff] }
 0x229   : > { %v1238_v56 = vadd.f32 %v1620_v26, %v1237_v33  ;;  %v1266_v54 = vadd.f32 %v1603_v36, %v1265_v22  ;;  %v1611_v50 = vsel %vm1058_vm6, 1.0, %v3300_v41  ;;  %vm1745_vm2 = vmpackc.low %vm1057_vm10, %vm1055_vm0  ;;  %vm1066_vm0 = vcmp.eq.f32.partialorder %v3402_v38, %v2544_v32 }
 0x22a   : > { %1738 = vmatpush1.bf16.msk.msra.mxu1 %vm1737_vm15, %v1928_v58  ;;  %vm3394_vm15 = vcmp.eq.f32.partialorder %v2356_v25, %v2438_v40  ;;  %v3397_v25 = vld [vmem:[#allocation18_spill] sm:$0xff]  ;;  %v1615_v44 = vsel %vm1062_vm3, 1.0, %v3300_v41  ;;  %vm3403_vm10 = vcmp.eq.f32.partialorder %v2408_v35, %v2438_v40  ;;  %vm1749_vm9 = vmpackc.low %vm1061_vm1, %vm1059_vm13  ;;  %vm1070_vm13 = vcmp.eq.f32.partialorder %v3406_v34, %v2544_v32 }
 0x22b   : > { %v1239_v37 = vadd.f32 %v1622_v11, %v1238_v56  ;;  %v1267_v52 = vadd.f32 %v1605_v51, %v1266_v54  ;;  %1740 = vmatprep.subr.msk.bf16.mxu1 %vm3392_vm11, %v1928_v58  ;;  %v1626_v53 = vsel %vm3394_vm15, 1.0, %v3300_v41  ;;  %vm1743_vm11 = vmpackc.low %vm1058_vm6, %vm1056_vm4  ;;  %vm1060_vm15 = vcmp.eq.f32.partialorder %v3397_v25, %v2544_v32 }
 0x22c   : > { %vm3399_vm4 = vcmp.eq.f32.partialorder %v2390_v9, %v2438_v40  ;;  %v1613_v28 = vsel %vm1060_vm15, 1.0, %v3300_v41  ;;  %vm1747_vm6 = vmpackc.low %vm1062_vm3, %vm1060_vm15  ;;  %vm3404_vm3 = vcmp.eq.f32.partialorder %v2414_v55, %v2438_v40  ;;  %v1619_v56 = vsel %vm1066_vm0, 1.0, %v3300_v41 }
 0x22d   : > { %v1240_v13 = vadd.f32 %v1624_v4, %v1239_v37  ;;  %v1268_v62 = vadd.f32 %v1607_v39, %v1267_v52  ;;  %v1630_v17 = vsel %vm3399_vm4, 1.0, %v3300_v41  ;;  %v1636_v35 = vsel %vm3404_vm3, 1.0, %v3300_v41 }
 0x22e   : > { %1742 = vmatpush1.bf16.msk.msra.mxu1 %vm1741_vm5, %v1928_v58  ;;  %vm3400_vm5 = vcmp.eq.f32.partialorder %v2401_v1, %v2438_v40  ;;  %v1634_v1 = vsel %vm3403_vm10, 1.0, %v3300_v41  ;;  %vm1068_vm4 = vcmp.eq.f32.partialorder %v3405_v49, %v2544_v32  ;;  %vm3407_vm1 = vcmp.eq.f32.partialorder %v2420_v27, %v2438_v40 }
 0x22f   : > { %v1241_v47 = vadd.f32 %v1626_v53, %v1240_v13  ;;  %v1269_v8 = vadd.f32 %v1609_v18, %v1268_v62  ;;  %1744 = vmatprep.subr.msk.bf16.mxu1 %vm1743_vm11, %v1928_v58  ;;  %v1632_v9 = vsel %vm3400_vm5, 1.0, %v3300_v41  ;;  %vm1064_vm11 = vcmp.eq.f32.partialorder %v3401_v45, %v2544_v32 }
 0x230   : > { %v1617_v19 = vsel %vm1064_vm11, 1.0, %v3300_v41  ;;  %vm1751_vm15 = vmpackc.low %vm1066_vm0, %vm1064_vm11  ;;  %v1638_v55 = vsel %vm3407_vm1, 1.0, %v3300_v41  ;;  %v1621_v54 = vsel %vm1068_vm4, 1.0, %v3300_v41  ;;  %vm3408_vm5 = vcmp.eq.f32.partialorder %v2426_v29, %v2438_v40 }
 0x231   : > { %v1242_v42 = vadd.f32 %v1628_v14, %v1241_v47  ;;  %v1270_v24 = vadd.f32 %v1611_v50, %v1269_v8  ;;  %v1640_v27 = vsel %vm3408_vm5, 1.0, %v3300_v41  ;;  %vm1072_vm11 = vcmp.eq.f32.partialorder %v3409_v10, %v2544_v32  ;;  %v3425_v47 = vld [vmem:[#allocation25_spill] sm:$0xff]  ;;  %v3430_v14 = vld [vmem:[#allocation26_spill] sm:$0xff]  ;;  %v1845_v8 = vld [vmem:[%s3199_s1] sm:$0xff] }
 0x232   : > { %1746 = vmatpush1.bf16.msk.msra.mxu1 %vm1745_vm2, %v1928_v58  ;;  %vm1753_vm2 = vmpackc.low %vm1065_vm14, %vm1063_vm8  ;;  %vm1074_vm8 = vcmp.eq.f32.partialorder %v3410_v5, %v2544_v32  ;;  %v1623_v4 = vsel %vm1070_vm13, 1.0, %v3300_v41  ;;  %vm3411_vm14 = vcmp.eq.f32.partialorder %v2432_v46, %v2438_v40  ;;  %v1625_v52 = vsel %vm1072_vm11, 1.0, %v3300_v41 }
 0x233   : > { %v1243_v6 = vadd.f32 %v1630_v17, %v1242_v42  ;;  %v1271_v43 = vadd.f32 %v1613_v28, %v1270_v24  ;;  %1748 = vmatprep.subr.msk.bf16.mxu1 %vm1747_vm6, %v1928_v58  ;;  %vm1755_vm6 = vmpackc.low %vm1070_vm13, %vm1068_vm4  ;;  %v1642_v29 = vsel %vm3411_vm14, 1.0, %v3300_v41  ;;  %vm3412_vm0 = vnez %v3297_v16  ;;  %v1399_v17 = vld [vmem:[%s2846_s22] sm:$0x1] }
 0x234   : > { %vm1759_vm10 = vmpackc.low %vm1074_vm8, %vm1072_vm11  ;;  %v1627_v39 = vsel %vm1074_vm8, 1.0, %v3300_v41  ;;  %vm3415_vm3 = vnez %v3347_v60  ;;  %vm3416_vm4 = vcmp.eq.f32.partialorder %v2396_v57, %v2544_v32  ;;  %vm3417_vm13 = vcmp.eq.f32.partialorder %v2404_v48, %v2544_v32 }
 0x235   : > { %v1244_v15 = vadd.f32 %v1632_v9, %v1243_v6  ;;  %v1272_v31 = vadd.f32 %v1615_v44, %v1271_v43  ;;  %v1631_v16 = vsel %vm3416_vm4, 1.0, %v3300_v41  ;;  %vm3418_vm1 = vnez %v3305_v21 }
 0x236   : > { %1750 = vmatpush1.bf16.msk.msra.mxu1 %vm1749_vm9, %v1928_v58  ;;  %vm3413_vm9 = vcmp.eq.f32.partialorder %v2394_v20, %v2544_v32  ;;  %v1633_v20 = vsel %vm3417_vm13, 1.0, %v3300_v41  ;;  %vm3421_vm5 = vcmp.eq.f32.partialorder %v2416_v7, %v2544_v32  ;;  %vm3422_vm11 = vnez %v3307_v30  ;;  %v3427_v30 = vld [vmem:[#allocation27_spill] sm:$0xff] }
 0x237   : > { %v1245_v33 = vadd.f32 %v1634_v1, %v1244_v15  ;;  %v1273_v26 = vadd.f32 %v1617_v19, %v1272_v31  ;;  %1752 = vmatprep.subr.msk.bf16.mxu1 %vm1751_vm15, %v1928_v58  ;;  %v1629_v46 = vsel %vm3413_vm9, 1.0, %v3300_v41  ;;  %vm3414_vm15 = vnez %v3299_v0 }
 0x238   : > { %v1637_v48 = vsel %vm3421_vm5, 1.0, %v3300_v41  ;;  %vm3423_vm8 = vnez %v3355_v12  ;;  %vm3424_vm14 = vcmp.eq.f32.partialorder %v2422_v61, %v2544_v32  ;;  %vm3431_vm9 = vcmp.eq.f32.partialorder %v3430_v14, %v2544_v32 }
 0x239   : > { %v1246_v22 = vadd.f32 %v1636_v35, %v1245_v33  ;;  %v1274_v36 = vadd.f32 %v1619_v56, %v1273_v26  ;;  %v1643_v61 = vsel %vm3431_vm9, 1.0, %v3300_v41 }
 0x23a   : > { %1754 = vmatpush1.bf16.msk.msra.mxu1 %vm1753_vm2, %v1928_v58  ;;  %vm3419_vm2 = vnez %v3351_v3 }
 0x23b   : > { %v1247_v11 = vadd.f32 %v1638_v55, %v1246_v22  ;;  %1756 = vmatprep.subr.msk.bf16.mxu1 %vm1755_vm6, %v1928_v58  ;;  %v1275_v37 = vadd.f32 %v1621_v54, %v1274_v36  ;;  %vm3420_vm6 = vcmp.eq.f32.partialorder %v2410_v63, %v2544_v32  ;;  %v1639_v63 = vsel %vm3424_vm14, 1.0, %v3300_v41 }
 0x23c   : > { %v1635_v57 = vsel %vm3420_vm6, 1.0, %v3300_v41 }
 0x23d   : > { %v1248_v51 = vadd.f32 %v1640_v27, %v1247_v11  ;;  %v1276_v2 = vadd.f32 %v1623_v4, %v1275_v37 }
 0x23e   : > { %1758 = vmatpush1.bf16.msk.msra.mxu1 %vm3412_vm0, %v1928_v58  ;;  %vm3426_vm0 = vcmp.eq.f32.partialorder %v3425_v47, %v2544_v32 }
 0x23f   : > { %v1249_v59 = vadd.f32 %v1642_v29, %v1248_v51  ;;  %1760 = vmatprep.subr.msk.bf16.mxu1 %vm1759_vm10, %v1928_v58  ;;  %v1277_v13 = vadd.f32 %v1625_v52, %v1276_v2  ;;  %v1641_v7 = vsel %vm3426_vm0, 1.0, %v3300_v41  ;;  %vm3428_vm10 = vnez %v3427_v30 }
 0x241   : > { %v1278_v53 = vadd.f32 %v1627_v39, %v1277_v13  ;;  %v1250_v32 = vrot.slane %v1249_v59, 4 }
 0x242   : > { %1762 = vmatpush1.bf16.msk.msra.mxu1 %vm3414_vm15, %v1928_v58  ;;  %vm3433_vm15 = vnez %v3432_v23 }
 0x243   : > { %1764 = vmatprep.subr.msk.bf16.mxu1 %vm3415_vm3, %v1928_v58  ;;  %v1279_v40 = vadd.f32 %v1629_v46, %v1278_v53  ;;  %v1251_v9 = vadd.f32 %v1250_v32, %v1249_v59 }
 0x245   : > { %v1280_v62 = vadd.f32 %v1631_v16, %v1279_v40  ;;  %v1252_v38 = vrot.slane %v1251_v9, 2 }
 0x246   : > { %1766 = vmatpush1.bf16.msk.msra.mxu1 %vm3418_vm1, %v1928_v58 }
 0x247   : > { %1768 = vmatprep.subr.msk.bf16.mxu1 %vm3419_vm2, %v1928_v58  ;;  %v1281_v0 = vadd.f32 %v1633_v20, %v1280_v62  ;;  %v1253_v43 = vadd.f32 %v1252_v38, %v1251_v9 }
 0x249   : > { %v1282_v60 = vadd.f32 %v1635_v57, %v1281_v0  ;;  %v1254_v44 = vrot.slane %v1253_v43, 1 }
 0x24a   : > { %1770 = vmatpush1.bf16.msk.msra.mxu1 %vm3422_vm11, %v1928_v58 }
 0x24b   : > { %1772 = vmatprep.subr.msk.bf16.mxu1 %vm3423_vm8, %v1928_v58  ;;  %v1283_v21 = vadd.f32 %v1637_v48, %v1282_v60  ;;  %v1255_v31 = vadd.f32 %v1254_v44, %v1253_v43 }
 0x24d   : > { %v1284_v3 = vadd.f32 %v1639_v63, %v1283_v21  ;;  %1841 = vrcp.f32 %v1255_v31 }
 0x24e   : > { %1774 = vmatpush1.bf16.msk.msra.mxu1 %vm3428_vm10, %v1928_v58 }
 0x24f   : > { %1776 = vmatprep.subr.msk.bf16.mxu1 %vm2777_vm12, %v1928_v58  ;;  %v1285_v18 = vadd.f32 %v1641_v7, %v1284_v3 }
 0x251   : > { %v1286_v25 = vadd.f32 %v1643_v61, %v1285_v18 }
 0x252   : > { %1778 = vmatpush1.bf16.msk.msra.mxu1 %vm3433_vm15, %v1928_v58 }
 0x253   : > { %v1287_v41 = vrot.slane %v1286_v25, 4 }
 0x255   : > { %1358 = vmatmul.mubr.f32.vlgmr.msra.gmra.mrb[0].mxu1 %v1845_v8  ;;  %v1288_v45 = vadd.f32 %v1287_v41, %v1286_v25 }
 0x257   : > { %v1289_v58 = vrot.slane %v1288_v45, 2  ;;  %v1842_v19 = vpop.eup %1841 }
 0x259   : > { %v1290_v15 = vadd.f32 %v1289_v58, %v1288_v45 }
 0x25b   : > { %v1291_v1 = vrot.slane %v1290_v15, 1 }
 0x25d   : > { %v1292_v33 = vadd.f32 %v1291_v1, %v1290_v15 }
 0x25f   : > { %1843 = vrcp.f32 %v1292_v33 }
 0x269   : > { %v1844_v49 = vpop.eup %1843 }
 0x29b   : > { %v1398_v42 = vpop.xlane.xlu1 %1397 }
 0x29c   : > { %v1400_v50 = vmul.f32 2.0, %v1398_v42 }
 0x29f   : > { %v1395_v24 = vpop.xlane.xlu1 %1394 }
 0x2a0   : > { %v1401_v6 = vadd.f32 %v1400_v50, %v1395_v24 }
 0x2a2   : > { %v1402_v28 = vadd.f32 %v1401_v6, %v1399_v17 }
 0x2a4   : > { %1404 = vst.msk [vmem:[%s2846_s22] sm:$0x1] %vm265_vm7, %v1402_v28 }
 0x328   : > { %v1359_v35 = vpop.f32.mrb[0].mxu1 }
 0x329   : > { %v1368_v34 = vmul.f32 %v1842_v19, %v1359_v35  ;;  %v1361_v26 = vpop.f32.mrb[1].mxu1 }
 0x32a   : > { %v1369_v22 = vmul.f32 %v1844_v49, %v1361_v26 }
 0x32c   : > { %v1372_v56 = vcombine.low %v1368_v34, %v1369_v22 }
 0x32e   : > { %1374 = vst [vmem:[%s232_s5] sm:$0xff] %v1372_v56 }
 0x32f   : > { %1859 = shalt.err (!%p1856_p5)
}
 0x330   : > { %s1860_s21 = scalar_lea.hbm %s3151_s10, 128  ;;  %s1864_s24 = scalar_lea.hbm %s3201_s3, 256 }
 0x331   : > { %p1861_p6 = scmp.ne.s32.totalorder %s3151_s10, %s1860_s21  ;;  %p1865_p10 = scmp.lt.u32.totalorder %s3151_s10, %s3201_s3 }
 0x332   : > { %p1866_p11 = scmp.lt.u32.totalorder %s1864_s24, %s1860_s21  ;;  %p1868_p13 = scmp.lt.u32.totalorder %s1860_s21, %s3151_s10 }
 0x333   : > { %p1862_p7 = pnand %p1861_p6, %p1995_p4 }
 0x334   : > { %p1867_p12 = por %p1866_p11, %p1865_p10 }
 0x335   : > { %p1863_p9 = pneg %p1862_p7 }
 0x336   : > { %p1869_p0 = por %p1868_p13, %p1867_p12 }
 0x338   : > { %p1870_p1 = pnand %p1869_p0, %p1863_p9 }
 0x33a   : > { %1873 = shalt.err (!%p1870_p1)
}
 0x33b   : > { %1779 = dma.vmem_to_hbm [thread:$0]  (%p1995_p4), %s3153_s6, 128, %s3151_s10, %s1406_s11  }
 0x33c PF: > { %p1785_p2 = scmp.ge.s32.totalorder %s1924_s20, 2  ;;  %s1444_s30 = sand.u32 1, %s1904_s15  }
 0x33d   : > { %s1445_s5 = scalar_lea.sflag [#allocation3], %s1444_s30 }
 0x33e   : > { %p1782_p3 = pnand %p1785_p2, %p2002_p8 }
 0x340   : > { %1899 = dma.done.wait (!%p1782_p3), %s1445_s5, 128  }
 0x341   : > { %1901 = vsyncadd (!%p1782_p3), %s1445_s5, 4294967168  ;;  %s18_s20 = sadd.s32 1, %s1924_s20   ;;  %s3434_s15 = smov %s1908_s16 }
 0x342   : > { %p15_p5 = scmp.ge.s32.totalorder %s18_s20, 4   ;;  %s3435_s16 = smov %s1912_s17 }
 0x343   : > { %s3436_s17 = smov %s2008_s28  ;;  %s3437_s18 = smov %s1920_s19 }
 0x344   : > { %s3438_s19 = smov %s3440_s23  ;;  %17 = sbr.rel (!%p15_p5) target bundleno = 4 (0x4), region = 83 }
 0x34b   :  { %1459 = vsyncpa [#allocation3], 1 }
 0x34c   :  { %1461 = vsyncpa [#allocation3 + $0x1], 1 }

</bundles_post_ra>
